<compile_context>
chip_gen: v7x
topology: tpu7x:2x2x1
jax: 0.10.0
libtpu: 0.0.40
codegen_flags: <defaults>
</compile_context>

<pallas_src>
import jax
import jax.numpy as jnp
from jax import lax
from jax.experimental import pallas as pl
from jax.experimental.pallas import tpu as pltpu


def _round_up(x, m):
    return ((x + m - 1) // m) * m


def lstm_recurrence_kernel(xg_ref, mask_ref, whh1_ref, w2_ref, b2_ref, wtag_ref, btag_ref,
                           tag_ref, lse_ref,
                           z_ref, c1_ref, c2_ref, m_ref, s_ref):
    """One grid step = one (batch tile, timestep).  Grid = (nb ["parallel"], T ["arbitrary"]).

      xg_ref   : (1, Bt, 4*Hp1)   precomputed x @ W_ih1 + b1 for this (t, batch tile)
      mask_ref : (1, Bt, Kp)      1.0 where t < lengths[b] else 0.0 (broadcast to Kp lanes)
      whh1_ref : (Hp1, 4*Hp1)     resident weight
      w2_ref   : (Hp1+Hp2, 4*Hp2) fused [W_ih2; W_hh2], resident;  b2_ref: (1, 4*Hp2)
      wtag_ref : (Hp2, Kp)        btag_ref: (1, Kp)
      tag_ref  : (1, Bt, Kp)      masked pre-softmax tag scores for this (t, batch tile)
      lse_ref  : (Bt, Kp)         logsumexp over time, written at t == T-1
      z_ref    : (Bt, Hp1+Hp2)    packed recurrent state [h1 | h2] (persists across t)
      c1_ref, c2_ref              cell states;  m_ref / s_ref: online-softmax running max / sum
    """
    t = pl.program_id(1)
    Hp1 = whh1_ref.shape[0]
    Hp2 = wtag_ref.shape[0]

    @pl.when(t == 0)
    def _():
        z_ref[...] = jnp.zeros_like(z_ref)
        c1_ref[...] = jnp.zeros_like(c1_ref)
        c2_ref[...] = jnp.zeros_like(c2_ref)
        m_ref[...] = jnp.full_like(m_ref, -jnp.inf)
        s_ref[...] = jnp.zeros_like(s_ref)

    def gates(g, H):
        # PyTorch gate order i, f, g, o; H is a multiple of 128 so every slice is lane-aligned.
        i = jax.nn.sigmoid(g[:, 0:H])
        f = jax.nn.sigmoid(g[:, H:2 * H])
        gg = jnp.tanh(g[:, 2 * H:3 * H])
        o = jax.nn.sigmoid(g[:, 3 * H:4 * H])
        return i, f, gg, o

    # ---- layer 1: input projection precomputed in XLA; only h1 @ W_hh1 on the serial path ----
    # TODO(synk): for large batches, hold W_hh1 / W2 resident in MXU staging via
    # pltpu.matmul_push_rhs / matmul_acc_lhs instead of re-pushing the constant RHS every step.
    h1_prev = z_ref[:, 0:Hp1]
    g1 = xg_ref[0] + jnp.dot(h1_prev, whh1_ref[...], preferred_element_type=jnp.float32)
    i1, f1, gg1, o1 = gates(g1, Hp1)
    c1 = f1 * c1_ref[...] + i1 * gg1
    h1 = o1 * jnp.tanh(c1)
    c1_ref[...] = c1
    z_ref[:, 0:Hp1] = h1                     # z now holds [h1_t | h2_{t-1}]

    # ---- layer 2: single fused gate matmul over [h1_t | h2_{t-1}], no concat materialized ----
    g2 = jnp.dot(z_ref[...], w2_ref[...], preferred_element_type=jnp.float32) + b2_ref[...]
    i2, f2, gg2, o2 = gates(g2, Hp2)
    c2 = f2 * c2_ref[...] + i2 * gg2
    h2 = o2 * jnp.tanh(c2)
    c2_ref[...] = c2
    z_ref[:, Hp1:Hp1 + Hp2] = h2

    # ---- tag head: mask applied to the matmul result (masked rows == bias row, identical to
    #      pad_packed_sequence zero-padding followed by the Linear layer) ----
    tag = (jnp.dot(h2, wtag_ref[...], preferred_element_type=jnp.float32) * mask_ref[0]
           + btag_ref[...])
    tag_ref[0] = tag

    # ---- streaming pass 1 of log_softmax over the SEQUENCE axis: online max / rescaled sum,
    #      O(1) vregs regardless of T ----
    m_new = jnp.maximum(m_ref[...], tag)
    s_ref[...] = s_ref[...] * jnp.exp(m_ref[...] - m_new) + jnp.exp(tag - m_new)
    m_ref[...] = m_new

    @pl.when(t == pl.num_programs(1) - 1)
    def _():
        lse_ref[...] = m_ref[...] + jnp.log(s_ref[...])


def logsoftmax_finalize_kernel(tag_ref, lse_ref, out_ref):
    # streaming pass 2: out[t] = tag[t] - logsumexp_over_time, finalised in place (aliased).
    out_ref[0] = tag_ref[0] - lse_ref[...]


def lstm_tagger_forward(params, tokens, casing, lengths):
    # ----- embedding gathers + concat (plain JAX glue, identical to the module) -----
    emb_tok = jnp.take(params["emb"], tokens, axis=0)               # (B, T, E)
    emb_case = jnp.take(params["emb_case"], casing, axis=0)         # identity embedding (B, T, C)
    x = jnp.concatenate([emb_tok, emb_case], axis=-1).astype(jnp.float32)   # (B, T, D)
    B, T, D = x.shape
    H1 = params["whh1"].shape[0]
    H2 = params["whh2"].shape[0]
    K = params["wtag"].shape[1]

    # padded sizes: zero padding is mathematically exact (padded units stay 0, feed zero weights).
    Hp1 = _round_up(H1, 128)
    Hp2 = _round_up(H2, 128)
    Kp = _round_up(K, 128)
    Bp = _round_up(B, 8)
    # batch tile: up to 128 rows per MXU push; batches > 128 split into a "parallel" grid axis so
    # v7x's two TensorCores each take half (no effect on v5e/v6e, single TC).
    Bt = Bp if Bp <= 128 else 128
    Bp = _round_up(Bp, Bt)
    nb = Bp // Bt

    # ----- weight padding (per-gate, zero-filled) -----
    def pad_gates(w, h, hp):
        w4 = w.reshape(w.shape[0], 4, h)
        return jnp.pad(w4, ((0, 0), (0, 0), (0, hp - h))).reshape(w.shape[0], 4 * hp)

    wih1 = pad_gates(params["wih1"], H1, Hp1)                                       # (D, 4Hp1)
    b1 = pad_gates(params["b1"], H1, Hp1)                                           # (1, 4Hp1)
    whh1 = jnp.pad(pad_gates(params["whh1"], H1, Hp1), ((0, Hp1 - H1), (0, 0)))     # (Hp1, 4Hp1)
    wih2 = jnp.pad(pad_gates(params["wih2"], H2, Hp2), ((0, Hp1 - H1), (0, 0)))     # (Hp1, 4Hp2)
    whh2 = jnp.pad(pad_gates(params["whh2"], H2, Hp2), ((0, Hp2 - H2), (0, 0)))     # (Hp2, 4Hp2)
    w2 = jnp.concatenate([wih2, whh2], axis=0)                                      # (Hp1+Hp2, 4Hp2)
    b2 = pad_gates(params["b2"], H2, Hp2)                                           # (1, 4Hp2)
    wtag = jnp.pad(params["wtag"], ((0, Hp2 - H2), (0, Kp - K)))                    # (Hp2, Kp)
    btag = jnp.pad(params["btag"], ((0, 0), (0, Kp - K)))                           # (1, Kp)
    # TODO(synk): for MXU-throughput-bound batches, cast h-state / weights to bf16 for the matmuls
    # (keep preferred_element_type=f32 and the c-state in f32); kept f32 here to match reference.

    # ----- time-major padded activations; one-shot layer-1 input projection runs in XLA -----
    x_tm = jnp.pad(jnp.transpose(x, (1, 0, 2)), ((0, 0), (0, Bp - B), (0, 0)))      # (T, Bp, D)
    xg = jnp.dot(x_tm, wih1) + b1                                                   # (T, Bp, 4Hp1)

    mask = (jnp.arange(T)[None, :] < lengths[:, None]).astype(jnp.float32)          # (B, T)
    mask_tm = jnp.pad(jnp.transpose(mask), ((0, 0), (0, Bp - B)))                   # (T, Bp)
    mask_b = jnp.broadcast_to(mask_tm[:, :, None], (T, Bp, Kp))                     # lane-dense

    grid = (nb, T)
    t_tile = lambda b, t: (t, b, 0)        # time-tiled activation streams
    resident = lambda b, t: (0, 0)         # weights: same block every step -> stay in VMEM

    rec_params = pltpu.CompilerParams(
        dimension_semantics=("parallel", "arbitrary"),   # batch || across cores, time sequential
        vmem_limit_bytes=32 * 1024 * 1024,               # weights + few tiles << 32 MiB; v7x-safe
    )

    tag_scores, lse = pl.pallas_call(
        lstm_recurrence_kernel,
        out_shape=(jax.ShapeDtypeStruct((T, Bp, Kp), jnp.float32),
                   jax.ShapeDtypeStruct((Bp, Kp), jnp.float32)),
        grid=grid,
        in_specs=[
            pl.BlockSpec((1, Bt, 4 * Hp1), t_tile),          # xg (time-tiled)
            pl.BlockSpec((1, Bt, Kp), t_tile),               # mask (time-tiled)
            pl.BlockSpec((Hp1, 4 * Hp1), resident),          # W_hh1
            pl.BlockSpec((Hp1 + Hp2, 4 * Hp2), resident),    # fused [W_ih2; W_hh2]
            pl.BlockSpec((1, 4 * Hp2), resident),            # b2
            pl.BlockSpec((Hp2, Kp), resident),               # W_tag
            pl.BlockSpec((1, Kp), resident),                 # b_tag
        ],
        out_specs=(
            pl.BlockSpec((1, Bt, Kp), t_tile),               # masked pre-softmax tag scores
            pl.BlockSpec((Bt, Kp), lambda b, t: (b, 0)),     # logsumexp over time (per batch tile)
        ),
        scratch_shapes=[
            pltpu.VMEM((Bt, Hp1 + Hp2), jnp.float32),        # packed [h1 | h2]
            pltpu.VMEM((Bt, Hp1), jnp.float32),              # c1
            pltpu.VMEM((Bt, Hp2), jnp.float32),              # c2
            pltpu.VMEM((Bt, Kp), jnp.float32),               # online-softmax running max
            pltpu.VMEM((Bt, Kp), jnp.float32),               # online-softmax running sum
        ],
        compiler_params=rec_params,
    )(xg, mask_b, whh1, w2, b2, wtag, btag)

    out_p = pl.pallas_call(
        logsoftmax_finalize_kernel,
        out_shape=jax.ShapeDtypeStruct((T, Bp, Kp), jnp.float32),
        grid=grid,
        in_specs=[pl.BlockSpec((1, Bt, Kp), t_tile),
                  pl.BlockSpec((Bt, Kp), lambda b, t: (b, 0))],
        out_specs=pl.BlockSpec((1, Bt, Kp), t_tile),
        input_output_aliases={0: 0},                         # finalize in place over tag_scores
        compiler_params=pltpu.CompilerParams(
            dimension_semantics=("parallel", "arbitrary")),
    )(tag_scores, lse)

    # strip padding + return batch-major (B, T, K), matching the PyTorch module
    return jnp.transpose(out_p[:, :B, :K], (1, 0, 2))


def reference_forward(params, tokens, casing, lengths):
    # pure-JAX reference of the PyTorch forward (for correctness check)
    emb_tok = jnp.take(params["emb"], tokens, axis=0)
    emb_case = jnp.take(params["emb_case"], casing, axis=0)
    x = jnp.concatenate([emb_tok, emb_case], axis=-1)
    B, T, _ = x.shape
    mask = (jnp.arange(T)[None, :] < lengths[:, None]).astype(jnp.float32)

    def run_lstm(x_seq, wih, whh, b, H):
        def step(carry, x_t):
            h, c = carry
            g = x_t @ wih + h @ whh + b
            i = jax.nn.sigmoid(g[:, :H])
            f = jax.nn.sigmoid(g[:, H:2 * H])
            gg = jnp.tanh(g[:, 2 * H:3 * H])
            o = jax.nn.sigmoid(g[:, 3 * H:])
            c = f * c + i * gg
            h = o * jnp.tanh(c)
            return (h, c), h
        h0 = jnp.zeros((B, H), jnp.float32)
        c0 = jnp.zeros((B, H), jnp.float32)
        _, hs = lax.scan(step, (h0, c0), jnp.transpose(x_seq, (1, 0, 2)))
        return jnp.transpose(hs, (1, 0, 2))

    H1 = params["whh1"].shape[0]
    H2 = params["whh2"].shape[0]
    h1 = run_lstm(x, params["wih1"], params["whh1"], params["b1"], H1)
    h2 = run_lstm(h1, params["wih2"], params["whh2"], params["b2"], H2)
    h2 = h2 * mask[:, :, None]
    tag = h2 @ params["wtag"] + params["btag"]
    return jax.nn.log_softmax(tag, axis=1)


if __name__ == "__main__":
    # small deterministic config
    vocab_size, embedding_dim = 12, 16
    case_size = 4
    hidden_dim_1, hidden_dim_2 = 32, 32
    tagset_size = 8
    B, T = 2, 8
    D = embedding_dim + case_size

    key = jax.random.PRNGKey(0)
    ks = jax.random.split(key, 12)

    def u(k, shape, scale):
        return jax.random.uniform(k, shape, jnp.float32, -scale, scale)

    s1 = 1.0 / jnp.sqrt(hidden_dim_1)
    s2 = 1.0 / jnp.sqrt(hidden_dim_2)
    params = {
        "emb": u(ks[0], (vocab_size, embedding_dim), 1.0),
        "emb_case": jnp.eye(case_size, dtype=jnp.float32),   # identity casing embedding
        # LSTM 1 (weights pre-transposed to (in, 4H); biases combined b_ih + b_hh)
        "wih1": u(ks[1], (D, 4 * hidden_dim_1), s1),
        "whh1": u(ks[2], (hidden_dim_1, 4 * hidden_dim_1), s1),
        "b1": u(ks[3], (1, 4 * hidden_dim_1), s1),
        # LSTM 2
        "wih2": u(ks[4], (hidden_dim_1, 4 * hidden_dim_2), s2),
        "whh2": u(ks[5], (hidden_dim_2, 4 * hidden_dim_2), s2),
        "b2": u(ks[6], (1, 4 * hidden_dim_2), s2),
        # hidden2tag Linear
        "wtag": u(ks[7], (hidden_dim_2, tagset_size), s2),
        "btag": u(ks[8], (1, tagset_size), s2),
    }

    tokens = jax.random.randint(ks[9], (B, T), 0, vocab_size)
    casing = jax.random.randint(ks[10], (B, T), 0, case_size)
    lengths = jnp.array([T, 5], dtype=jnp.int32)  # sorted descending (pack_padded requirement)

    # pack/pad_packed semantics only reproduced when the longest sequence spans the full T axis
    assert int(lengths.max()) == T, "max(lengths) must equal T (same assumption as the reference)"

    forward = jax.jit(lstm_tagger_forward)
    out = forward(params, tokens, casing, lengths)
    out = jax.block_until_ready(out)

    ref = reference_forward(params, tokens, casing, lengths)
    assert out.shape == (B, T, tagset_size)
    assert jnp.allclose(out, ref, rtol=1e-4, atol=1e-4), "mismatch vs JAX reference"

    print("KERNEL_OK")
</pallas_src>

<mosaic_0001>
module attributes {stable_mosaic.version = 11 : i64} {
  func.func @logsoftmax_finalize_kernel(%arg0: i32, %arg1: i32, %arg2: memref<1x8x128xf32, #tpu.memory_space<vmem>>, %arg3: memref<8x128xf32, #tpu.memory_space<vmem>>, %arg4: memref<1x8x128xf32, #tpu.memory_space<vmem>>) attributes {dimension_semantics = [#tpu.dimension_semantics<parallel>, #tpu.dimension_semantics<arbitrary>], iteration_bounds = array<i64: 1, 8>, scalar_prefetch = 0 : i64, scratch_operands = 0 : i64, tpu.core_type = #tpu.core_type<tc>, window_params = [{transform_indices = @transform_0, window_bounds = array<i64: 1, 8, 128>}, {transform_indices = @transform_1, window_bounds = array<i64: 8, 128>}, {transform_indices = @transform_2, window_bounds = array<i64: 1, 8, 128>}]} {
    %c0 = arith.constant 0 : index
    %c0_0 = arith.constant 0 : index
    %c0_1 = arith.constant 0 : index
    %0 = vector.load %arg2[%c0, %c0_0, %c0_1] : memref<1x8x128xf32, #tpu.memory_space<vmem>>, vector<1x8x128xf32>
    %1 = vector.shape_cast %0 : vector<1x8x128xf32> to vector<8x128xf32>
    %c0_2 = arith.constant 0 : index
    %c0_3 = arith.constant 0 : index
    %2 = vector.load %arg3[%c0_2, %c0_3] : memref<8x128xf32, #tpu.memory_space<vmem>>, vector<8x128xf32>
    %3 = arith.subf %1, %2 : vector<8x128xf32>
    %c0_4 = arith.constant 0 : index
    %c0_5 = arith.constant 0 : index
    %c0_6 = arith.constant 0 : index
    %4 = vector.load %arg4[%c0_4, %c0_5, %c0_6] : memref<1x8x128xf32, #tpu.memory_space<vmem>>, vector<1x8x128xf32>
    %5 = vector.shape_cast %4 : vector<1x8x128xf32> to vector<8x128xf32>
    %6 = vector.shape_cast %3 : vector<8x128xf32> to vector<1x8x128xf32>
    tpu.vector_store %arg4[%c0_4, %c0_5, %c0_6], %6 {strides = array<i32>} : memref<1x8x128xf32, #tpu.memory_space<vmem>>, vector<1x8x128xf32>,
    return
  }
  func.func @transform_0(%arg0: i32, %arg1: i32) -> (i32, i32, i32) {
    %c0_i32 = arith.constant 0 : i32
    %c0_i32_0 = arith.constant 0 : i32
    return %arg1, %arg0, %c0_i32 : i32, i32, i32
  }
  func.func @transform_1(%arg0: i32, %arg1: i32) -> (i32, i32) {
    %c0_i32 = arith.constant 0 : i32
    %c0_i32_0 = arith.constant 0 : i32
    return %arg0, %c0_i32 : i32, i32
  }
  func.func @transform_2(%arg0: i32, %arg1: i32) -> (i32, i32, i32) {
    %c0_i32 = arith.constant 0 : i32
    %c0_i32_0 = arith.constant 0 : i32
    return %arg1, %arg0, %c0_i32 : i32, i32, i32
  }
}

module attributes {stable_mosaic.version = 11 : i64} {
  func.func @lstm_recurrence_kernel(%arg0: i32, %arg1: i32, %arg2: memref<1x8x512xf32, #tpu.memory_space<vmem>>, %arg3: memref<1x8x128xf32, #tpu.memory_space<vmem>>, %arg4: memref<128x512xf32, #tpu.memory_space<vmem>>, %arg5: memref<256x512xf32, #tpu.memory_space<vmem>>, %arg6: memref<1x512xf32, #tpu.memory_space<vmem>>, %arg7: memref<128x128xf32, #tpu.memory_space<vmem>>, %arg8: memref<1x128xf32, #tpu.memory_space<vmem>>, %arg9: memref<1x8x128xf32, #tpu.memory_space<vmem>>, %arg10: memref<8x128xf32, #tpu.memory_space<vmem>>, %arg11: memref<8x256xf32, #tpu.memory_space<vmem>>, %arg12: memref<8x128xf32, #tpu.memory_space<vmem>>, %arg13: memref<8x128xf32, #tpu.memory_space<vmem>>, %arg14: memref<8x128xf32, #tpu.memory_space<vmem>>, %arg15: memref<8x128xf32, #tpu.memory_space<vmem>>) attributes {dimension_semantics = [#tpu.dimension_semantics<parallel>, #tpu.dimension_semantics<arbitrary>], iteration_bounds = array<i64: 1, 8>, scalar_prefetch = 0 : i64, scratch_operands = 5 : i64, tpu.core_type = #tpu.core_type<tc>, window_params = [{transform_indices = @transform_0, window_bounds = array<i64: 1, 8, 512>}, {transform_indices = @transform_1, window_bounds = array<i64: 1, 8, 128>}, {pipeline_mode = #tpu.pipeline_mode<synchronous>, transform_indices = @transform_2, window_bounds = array<i64: 128, 512>}, {pipeline_mode = #tpu.pipeline_mode<synchronous>, transform_indices = @transform_3, window_bounds = array<i64: 256, 512>}, {pipeline_mode = #tpu.pipeline_mode<synchronous>, transform_indices = @transform_4, window_bounds = array<i64: 1, 512>}, {pipeline_mode = #tpu.pipeline_mode<synchronous>, transform_indices = @transform_5, window_bounds = array<i64: 128, 128>}, {pipeline_mode = #tpu.pipeline_mode<synchronous>, transform_indices = @transform_6, window_bounds = array<i64: 1, 128>}, {transform_indices = @transform_7, window_bounds = array<i64: 1, 8, 128>}, {transform_indices = @transform_8, window_bounds = array<i64: 8, 128>}]} {
    %c0_i32 = arith.constant 0 : i32
    %0 = arith.cmpi eq, %arg1, %c0_i32 : i32
    %1 = arith.extui %0 : i1 to i32
    %c0_i32_0 = arith.constant 0 : i32
    %2 = arith.cmpi ne, %1, %c0_i32_0 : i32
    scf.if %2 {
      %cst_53 = arith.constant 0.000000e+00 : f32
      %97 = vector.broadcast %cst_53 : f32 to vector<8x256xf32>
      %c0_54 = arith.constant 0 : index
      %c0_55 = arith.constant 0 : index
      %98 = vector.load %arg11[%c0_54, %c0_55] : memref<8x256xf32, #tpu.memory_space<vmem>>, vector<8x256xf32>
      tpu.vector_store %arg11[%c0_54, %c0_55], %97 {strides = array<i32>} : memref<8x256xf32, #tpu.memory_space<vmem>>, vector<8x256xf32>,
      %cst_56 = arith.constant 0.000000e+00 : f32
      %99 = vector.broadcast %cst_56 : f32 to vector<8x128xf32>
      %c0_57 = arith.constant 0 : index
      %c0_58 = arith.constant 0 : index
      %100 = vector.load %arg12[%c0_57, %c0_58] : memref<8x128xf32, #tpu.memory_space<vmem>>, vector<8x128xf32>
      tpu.vector_store %arg12[%c0_57, %c0_58], %99 {strides = array<i32>} : memref<8x128xf32, #tpu.memory_space<vmem>>, vector<8x128xf32>,
      %cst_59 = arith.constant 0.000000e+00 : f32
      %101 = vector.broadcast %cst_59 : f32 to vector<8x128xf32>
      %c0_60 = arith.constant 0 : index
      %c0_61 = arith.constant 0 : index
      %102 = vector.load %arg13[%c0_60, %c0_61] : memref<8x128xf32, #tpu.memory_space<vmem>>, vector<8x128xf32>
      tpu.vector_store %arg13[%c0_60, %c0_61], %101 {strides = array<i32>} : memref<8x128xf32, #tpu.memory_space<vmem>>, vector<8x128xf32>,
      %cst_62 = arith.constant 0xFF800000 : f32
      %103 = vector.broadcast %cst_62 : f32 to vector<8x128xf32>
      %c0_63 = arith.constant 0 : index
      %c0_64 = arith.constant 0 : index
      %104 = vector.load %arg14[%c0_63, %c0_64] : memref<8x128xf32, #tpu.memory_space<vmem>>, vector<8x128xf32>
      tpu.vector_store %arg14[%c0_63, %c0_64], %103 {strides = array<i32>} : memref<8x128xf32, #tpu.memory_space<vmem>>, vector<8x128xf32>,
      %cst_65 = arith.constant 0.000000e+00 : f32
      %105 = vector.broadcast %cst_65 : f32 to vector<8x128xf32>
      %c0_66 = arith.constant 0 : index
      %c0_67 = arith.constant 0 : index
      %106 = vector.load %arg15[%c0_66, %c0_67] : memref<8x128xf32, #tpu.memory_space<vmem>>, vector<8x128xf32>
      tpu.vector_store %arg15[%c0_66, %c0_67], %105 {strides = array<i32>} : memref<8x128xf32, #tpu.memory_space<vmem>>, vector<8x128xf32>,
    } else {
    }
    %c0 = arith.constant 0 : index
    %c0_1 = arith.constant 0 : index
    %3 = vector.load %arg11[%c0, %c0_1] : memref<8x256xf32, #tpu.memory_space<vmem>>, vector<8x128xf32>
    %c0_2 = arith.constant 0 : index
    %c0_3 = arith.constant 0 : index
    %c0_4 = arith.constant 0 : index
    %4 = vector.load %arg2[%c0_2, %c0_3, %c0_4] : memref<1x8x512xf32, #tpu.memory_space<vmem>>, vector<1x8x512xf32>
    %5 = vector.shape_cast %4 : vector<1x8x512xf32> to vector<8x512xf32>
    %c0_5 = arith.constant 0 : index
    %c0_6 = arith.constant 0 : index
    %6 = vector.load %arg4[%c0_5, %c0_6] : memref<128x512xf32, #tpu.memory_space<vmem>>, vector<128x512xf32>
    %cst = arith.constant dense<0.000000e+00> : vector<8x512xf32>
    %7 = tpu.matmul %3, %6, %cst {dimension_numbers = #tpu.dot_dimension_numbers<[1], [0], [0], [1], [0, 0, 1, 1], [], []>} : vector<8x128xf32>, vector<128x512xf32>, vector<8x512xf32> -> vector<8x512xf32>
    %8 = arith.addf %5, %7 : vector<8x512xf32>
    %9 = vector.extract_strided_slice %8 {offsets = [0, 0], sizes = [8, 128], strides = [1, 1]} : vector<8x512xf32> to vector<8x128xf32>
    %10 = arith.negf %9 : vector<8x128xf32>
    %11 = math.exp %10 : vector<8x128xf32>
    %cst_7 = arith.constant 1.000000e+00 : f32
    %12 = vector.broadcast %cst_7 : f32 to vector<8x128xf32>
    %13 = arith.addf %12, %11 : vector<8x128xf32>
    %14 = arith.divf %12, %13 : vector<8x128xf32>
    %15 = vector.extract_strided_slice %8 {offsets = [0, 128], sizes = [8, 128], strides = [1, 1]} : vector<8x512xf32> to vector<8x128xf32>
    %16 = arith.negf %15 : vector<8x128xf32>
    %17 = math.exp %16 : vector<8x128xf32>
    %cst_8 = arith.constant 1.000000e+00 : f32
    %18 = vector.broadcast %cst_8 : f32 to vector<8x128xf32>
    %19 = arith.addf %18, %17 : vector<8x128xf32>
    %20 = arith.divf %18, %19 : vector<8x128xf32>
    %21 = vector.extract_strided_slice %8 {offsets = [0, 256], sizes = [8, 128], strides = [1, 1]} : vector<8x512xf32> to vector<8x128xf32>
    %22 = math.tanh %21 : vector<8x128xf32>
    %23 = vector.extract_strided_slice %8 {offsets = [0, 384], sizes = [8, 128], strides = [1, 1]} : vector<8x512xf32> to vector<8x128xf32>
    %24 = arith.negf %23 : vector<8x128xf32>
    %25 = math.exp %24 : vector<8x128xf32>
    %cst_9 = arith.constant 1.000000e+00 : f32
    %26 = vector.broadcast %cst_9 : f32 to vector<8x128xf32>
    %27 = arith.addf %26, %25 : vector<8x128xf32>
    %28 = arith.divf %26, %27 : vector<8x128xf32>
    %c0_10 = arith.constant 0 : index
    %c0_11 = arith.constant 0 : index
    %29 = vector.load %arg12[%c0_10, %c0_11] : memref<8x128xf32, #tpu.memory_space<vmem>>, vector<8x128xf32>
    %30 = arith.mulf %20, %29 : vector<8x128xf32>
    %31 = arith.mulf %14, %22 : vector<8x128xf32>
    %32 = arith.addf %30, %31 : vector<8x128xf32>
    %33 = math.tanh %32 : vector<8x128xf32>
    %34 = arith.mulf %28, %33 : vector<8x128xf32>
    %c0_12 = arith.constant 0 : index
    %c0_13 = arith.constant 0 : index
    %35 = vector.load %arg12[%c0_12, %c0_13] : memref<8x128xf32, #tpu.memory_space<vmem>>, vector<8x128xf32>
    tpu.vector_store %arg12[%c0_12, %c0_13], %32 {strides = array<i32>} : memref<8x128xf32, #tpu.memory_space<vmem>>, vector<8x128xf32>,
    %c0_14 = arith.constant 0 : index
    %c0_15 = arith.constant 0 : index
    %36 = vector.load %arg11[%c0_14, %c0_15] : memref<8x256xf32, #tpu.memory_space<vmem>>, vector<8x128xf32>
    tpu.vector_store %arg11[%c0_14, %c0_15], %34 {strides = array<i32>} : memref<8x256xf32, #tpu.memory_space<vmem>>, vector<8x128xf32>,
    %c0_16 = arith.constant 0 : index
    %c0_17 = arith.constant 0 : index
    %37 = vector.load %arg11[%c0_16, %c0_17] : memref<8x256xf32, #tpu.memory_space<vmem>>, vector<8x256xf32>
    %c0_18 = arith.constant 0 : index
    %c0_19 = arith.constant 0 : index
    %38 = vector.load %arg5[%c0_18, %c0_19] : memref<256x512xf32, #tpu.memory_space<vmem>>, vector<256x512xf32>
    %cst_20 = arith.constant dense<0.000000e+00> : vector<8x512xf32>
    %39 = tpu.matmul %37, %38, %cst_20 {dimension_numbers = #tpu.dot_dimension_numbers<[1], [0], [0], [1], [0, 0, 1, 1], [], []>} : vector<8x256xf32>, vector<256x512xf32>, vector<8x512xf32> -> vector<8x512xf32>
    %c0_21 = arith.constant 0 : index
    %c0_22 = arith.constant 0 : index
    %40 = vector.load %arg6[%c0_21, %c0_22] : memref<1x512xf32, #tpu.memory_space<vmem>>, vector<1x512xf32>
    %41 = vector.broadcast %40 : vector<1x512xf32> to vector<8x512xf32>
    %42 = arith.addf %39, %41 : vector<8x512xf32>
    %43 = vector.extract_strided_slice %42 {offsets = [0, 0], sizes = [8, 128], strides = [1, 1]} : vector<8x512xf32> to vector<8x128xf32>
    %44 = arith.negf %43 : vector<8x128xf32>
    %45 = math.exp %44 : vector<8x128xf32>
    %cst_23 = arith.constant 1.000000e+00 : f32
    %46 = vector.broadcast %cst_23 : f32 to vector<8x128xf32>
    %47 = arith.addf %46, %45 : vector<8x128xf32>
    %48 = arith.divf %46, %47 : vector<8x128xf32>
    %49 = vector.extract_strided_slice %42 {offsets = [0, 128], sizes = [8, 128], strides = [1, 1]} : vector<8x512xf32> to vector<8x128xf32>
    %50 = arith.negf %49 : vector<8x128xf32>
    %51 = math.exp %50 : vector<8x128xf32>
    %cst_24 = arith.constant 1.000000e+00 : f32
    %52 = vector.broadcast %cst_24 : f32 to vector<8x128xf32>
    %53 = arith.addf %52, %51 : vector<8x128xf32>
    %54 = arith.divf %52, %53 : vector<8x128xf32>
    %55 = vector.extract_strided_slice %42 {offsets = [0, 256], sizes = [8, 128], strides = [1, 1]} : vector<8x512xf32> to vector<8x128xf32>
    %56 = math.tanh %55 : vector<8x128xf32>
    %57 = vector.extract_strided_slice %42 {offsets = [0, 384], sizes = [8, 128], strides = [1, 1]} : vector<8x512xf32> to vector<8x128xf32>
    %58 = arith.negf %57 : vector<8x128xf32>
    %59 = math.exp %58 : vector<8x128xf32>
    %cst_25 = arith.constant 1.000000e+00 : f32
    %60 = vector.broadcast %cst_25 : f32 to vector<8x128xf32>
    %61 = arith.addf %60, %59 : vector<8x128xf32>
    %62 = arith.divf %60, %61 : vector<8x128xf32>
    %c0_26 = arith.constant 0 : index
    %c0_27 = arith.constant 0 : index
    %63 = vector.load %arg13[%c0_26, %c0_27] : memref<8x128xf32, #tpu.memory_space<vmem>>, vector<8x128xf32>
    %64 = arith.mulf %54, %63 : vector<8x128xf32>
    %65 = arith.mulf %48, %56 : vector<8x128xf32>
    %66 = arith.addf %64, %65 : vector<8x128xf32>
    %67 = math.tanh %66 : vector<8x128xf32>
    %68 = arith.mulf %62, %67 : vector<8x128xf32>
    %c0_28 = arith.constant 0 : index
    %c0_29 = arith.constant 0 : index
    %69 = vector.load %arg13[%c0_28, %c0_29] : memref<8x128xf32, #tpu.memory_space<vmem>>, vector<8x128xf32>
    tpu.vector_store %arg13[%c0_28, %c0_29], %66 {strides = array<i32>} : memref<8x128xf32, #tpu.memory_space<vmem>>, vector<8x128xf32>,
    %c0_30 = arith.constant 0 : index
    %c128 = arith.constant 128 : index
    %70 = vector.load %arg11[%c0_30, %c128] : memref<8x256xf32, #tpu.memory_space<vmem>>, vector<8x128xf32>
    tpu.vector_store %arg11[%c0_30, %c128], %68 {strides = array<i32>} : memref<8x256xf32, #tpu.memory_space<vmem>>, vector<8x128xf32>,
    %c0_31 = arith.constant 0 : index
    %c0_32 = arith.constant 0 : index
    %71 = vector.load %arg7[%c0_31, %c0_32] : memref<128x128xf32, #tpu.memory_space<vmem>>, vector<128x128xf32>
    %cst_33 = arith.constant dense<0.000000e+00> : vector<8x128xf32>
    %72 = tpu.matmul %68, %71, %cst_33 {dimension_numbers = #tpu.dot_dimension_numbers<[1], [0], [0], [1], [0, 0, 1, 1], [], []>} : vector<8x128xf32>, vector<128x128xf32>, vector<8x128xf32> -> vector<8x128xf32>
    %c0_34 = arith.constant 0 : index
    %c0_35 = arith.constant 0 : index
    %c0_36 = arith.constant 0 : index
    %73 = vector.load %arg3[%c0_34, %c0_35, %c0_36] : memref<1x8x128xf32, #tpu.memory_space<vmem>>, vector<1x8x128xf32>
    %74 = vector.shape_cast %73 : vector<1x8x128xf32> to vector<8x128xf32>
    %75 = arith.mulf %72, %74 : vector<8x128xf32>
    %c0_37 = arith.constant 0 : index
    %c0_38 = arith.constant 0 : index
    %76 = vector.load %arg8[%c0_37, %c0_38] : memref<1x128xf32, #tpu.memory_space<vmem>>, vector<1x128xf32>
    %77 = vector.broadcast %76 : vector<1x128xf32> to vector<8x128xf32>
    %78 = arith.addf %75, %77 : vector<8x128xf32>
    %c0_39 = arith.constant 0 : index
    %c0_40 = arith.constant 0 : index
    %c0_41 = arith.constant 0 : index
    %79 = vector.load %arg9[%c0_39, %c0_40, %c0_41] : memref<1x8x128xf32, #tpu.memory_space<vmem>>, vector<1x8x128xf32>
    %80 = vector.shape_cast %79 : vector<1x8x128xf32> to vector<8x128xf32>
    %81 = vector.shape_cast %78 : vector<8x128xf32> to vector<1x8x128xf32>
    tpu.vector_store %arg9[%c0_39, %c0_40, %c0_41], %81 {strides = array<i32>} : memref<1x8x128xf32, #tpu.memory_space<vmem>>, vector<1x8x128xf32>,
    %c0_42 = arith.constant 0 : index
    %c0_43 = arith.constant 0 : index
    %82 = vector.load %arg14[%c0_42, %c0_43] : memref<8x128xf32, #tpu.memory_space<vmem>>, vector<8x128xf32>
    %83 = arith.maximumf %82, %78 : vector<8x128xf32>
    %c0_44 = arith.constant 0 : index
    %c0_45 = arith.constant 0 : index
    %84 = vector.load %arg15[%c0_44, %c0_45] : memref<8x128xf32, #tpu.memory_space<vmem>>, vector<8x128xf32>
    %c0_46 = arith.constant 0 : index
    %c0_47 = arith.constant 0 : index
    %85 = vector.load %arg14[%c0_46, %c0_47] : memref<8x128xf32, #tpu.memory_space<vmem>>, vector<8x128xf32>
    %86 = arith.subf %85, %83 : vector<8x128xf32>
    %87 = math.exp %86 : vector<8x128xf32>
    %88 = arith.mulf %84, %87 : vector<8x128xf32>
    %89 = arith.subf %78, %83 : vector<8x128xf32>
    %90 = math.exp %89 : vector<8x128xf32>
    %91 = arith.addf %88, %90 : vector<8x128xf32>
    %c0_48 = arith.constant 0 : index
    %c0_49 = arith.constant 0 : index
    %92 = vector.load %arg15[%c0_48, %c0_49] : memref<8x128xf32, #tpu.memory_space<vmem>>, vector<8x128xf32>
    tpu.vector_store %arg15[%c0_48, %c0_49], %91 {strides = array<i32>} : memref<8x128xf32, #tpu.memory_space<vmem>>, vector<8x128xf32>,
    %c0_50 = arith.constant 0 : index
    %c0_51 = arith.constant 0 : index
    %93 = vector.load %arg14[%c0_50, %c0_51] : memref<8x128xf32, #tpu.memory_space<vmem>>, vector<8x128xf32>
    tpu.vector_store %arg14[%c0_50, %c0_51], %83 {strides = array<i32>} : memref<8x128xf32, #tpu.memory_space<vmem>>, vector<8x128xf32>,
    %c7_i32 = arith.constant 7 : i32
    %94 = arith.cmpi eq, %arg1, %c7_i32 : i32
    %95 = arith.extui %94 : i1 to i32
    %c0_i32_52 = arith.constant 0 : i32
    %96 = arith.cmpi ne, %95, %c0_i32_52 : i32
    scf.if %96 {
      %c0_53 = arith.constant 0 : index
      %c0_54 = arith.constant 0 : index
      %97 = vector.load %arg14[%c0_53, %c0_54] : memref<8x128xf32, #tpu.memory_space<vmem>>, vector<8x128xf32>
      %c0_55 = arith.constant 0 : index
      %c0_56 = arith.constant 0 : index
      %98 = vector.load %arg15[%c0_55, %c0_56] : memref<8x128xf32, #tpu.memory_space<vmem>>, vector<8x128xf32>
      %99 = math.log %98 : vector<8x128xf32>
      %100 = arith.addf %97, %99 : vector<8x128xf32>
      %c0_57 = arith.constant 0 : index
      %c0_58 = arith.constant 0 : index
      %101 = vector.load %arg10[%c0_57, %c0_58] : memref<8x128xf32, #tpu.memory_space<vmem>>, vector<8x128xf32>
      tpu.vector_store %arg10[%c0_57, %c0_58], %100 {strides = array<i32>} : memref<8x128xf32, #tpu.memory_space<vmem>>, vector<8x128xf32>,
    } else {
    }
    return
  }
  func.func @transform_0(%arg0: i32, %arg1: i32) -> (i32, i32, i32) {
    %c0_i32 = arith.constant 0 : i32
    %c0_i32_0 = arith.constant 0 : i32
    return %arg1, %arg0, %c0_i32 : i32, i32, i32
  }
  func.func @transform_1(%arg0: i32, %arg1: i32) -> (i32, i32, i32) {
    %c0_i32 = arith.constant 0 : i32
    %c0_i32_0 = arith.constant 0 : i32
    return %arg1, %arg0, %c0_i32 : i32, i32, i32
  }
  func.func @transform_2(%arg0: i32, %arg1: i32) -> (i32, i32) {
    %c0_i32 = arith.constant 0 : i32
    %c0_i32_0 = arith.constant 0 : i32
    %c0_i32_1 = arith.constant 0 : i32
    return %c0_i32, %c0_i32_0 : i32, i32
  }
  func.func @transform_3(%arg0: i32, %arg1: i32) -> (i32, i32) {
    %c0_i32 = arith.constant 0 : i32
    %c0_i32_0 = arith.constant 0 : i32
    %c0_i32_1 = arith.constant 0 : i32
    return %c0_i32, %c0_i32_0 : i32, i32
  }
  func.func @transform_4(%arg0: i32, %arg1: i32) -> (i32, i32) {
    %c0_i32 = arith.constant 0 : i32
    %c0_i32_0 = arith.constant 0 : i32
    %c0_i32_1 = arith.constant 0 : i32
    return %c0_i32, %c0_i32_0 : i32, i32
  }
  func.func @transform_5(%arg0: i32, %arg1: i32) -> (i32, i32) {
    %c0_i32 = arith.constant 0 : i32
    %c0_i32_0 = arith.constant 0 : i32
    %c0_i32_1 = arith.constant 0 : i32
    return %c0_i32, %c0_i32_0 : i32, i32
  }
  func.func @transform_6(%arg0: i32, %arg1: i32) -> (i32, i32) {
    %c0_i32 = arith.constant 0 : i32
    %c0_i32_0 = arith.constant 0 : i32
    %c0_i32_1 = arith.constant 0 : i32
    return %c0_i32, %c0_i32_0 : i32, i32
  }
  func.func @transform_7(%arg0: i32, %arg1: i32) -> (i32, i32, i32) {
    %c0_i32 = arith.constant 0 : i32
    %c0_i32_0 = arith.constant 0 : i32
    return %arg1, %arg0, %c0_i32 : i32, i32, i32
  }
  func.func @transform_8(%arg0: i32, %arg1: i32) -> (i32, i32) {
    %c0_i32 = arith.constant 0 : i32
    %c0_i32_0 = arith.constant 0 : i32
    return %arg0, %c0_i32 : i32, i32
  }
}

</mosaic_0001>

<bundles_post_ra>
// kernel: lstm_tagger_forward.3
= control target key start
LH: loop header
LB: loop body
LE: loop exit
PB: predicated region body
PF: predicated region fallthrough
CT: control target
= control target key end

     0   :  { %s354_s9 = smov 0   ;;  %s331_s10 = smov 0   ;;  %s368_s0 = inlined_call_operand.vmem [shape: f32[8,8,128], index: 0, kind: input, shape index: {}, may-alias: {0,2}]   ;;  %s369_s1 = inlined_call_operand.vmem [shape: f32[8,128], index: 1, kind: input, shape index: {}]   ;;  %s370_s2 = inlined_call_operand.vmem [shape: f32[8,8,128], index: 2, kind: output, shape index: {}, may-alias: {0,2}]  }
   0x1   :  { %s335_s11 = smov 0  }
   0x2 LB: > { %s21_s12 = sadd.s32 1, %s333_s10  ;;  %p286_p0 = scmp.ge.s32.totalorder %s337_s11, 1  ;;  %s337_s11 = sphi %s335_s11, %s12_s11   ;;  %s333_s10 = sphi %s331_s10, %s332_s10   ;;  %s329_s9 = sphi %s354_s9, %s371_s9  }
   0x3   : > { %p22_p1 = scmp.ge.s32.totalorder %s21_s12, 8  ;;  %p139_p2 = scmp.lt.s32.totalorder %s337_s11, 9 }
   0x5   : > { %s373_s12 = smov (%p22_p1, %s21_s12), 0  ;;  %p140_p3 = pnand %p286_p0, %p139_p2 }
   0x6   : > { %p169_p4 = scmp.lt.s32.totalorder (!%p140_p3), %s329_s9, 7  ;;  %v188_v0 = vld [vmem:[%s369_s1] sm:$0xff] (!%p140_p3) }
   0x7   : > { %143 = sbr.rel (%p140_p3) target bundleno = 21 (0x15), region = 28 }
   0xe   : > { %s375_s9 = smov (!%p169_p4, %s329_s9), 7 }
   0xf   : > { %s287_s13 = sshll.u32 %s375_s9, 3 }
  0x10   : > { %s175_s18 = scalar_lea.vmem %s368_s0, %s287_s13  ;;  %s186_s21 = scalar_lea.vmem %s370_s2, %s287_s13 }
  0x11   : > { %v187_v1 = vld [vmem:[%s175_s18] sm:$0xff] }
  0x12   : > { %v189_v2 = vsub.f32 %v187_v1, %v188_v0 }
  0x14   : > { %190 = vst [vmem:[%s186_s21] sm:$0xff] %v189_v2 }
  0x15 PF: > { %s12_s11 = sadd.s32 1, %s337_s11   ;;  %s371_s9 = smov %s333_s10 }
  0x16   : > { %p9_p5 = scmp.ge.s32.totalorder %s12_s11, 10   ;;  %s332_s10 = smov %s373_s12  }
  0x18   :  { %11 = sbr.rel (!%p9_p5) target bundleno = 2 (0x2), region = 61 }

// kernel: lstm_tagger_forward.2
= control target key start
LH: loop header
LB: loop body
LE: loop exit
PB: predicated region body
PF: predicated region fallthrough
CT: control target
= control target key end

     0   :  { %s1625_s27 = smov 0   ;;  %s1627_s28 = smov 0   ;;  %s2315_s0 = inlined_call_operand.vmem [shape: f32[8,8,512], index: 0, kind: input, shape index: {}]   ;;  %s2316_s1 = inlined_call_operand.vmem [shape: f32[8,8,128], index: 1, kind: input, shape index: {}]   ;;  %s2317_s2 = inlined_call_operand.vmem [shape: f32[128,512], index: 2, kind: input, shape index: {}]   ;;  %s2318_s3 = inlined_call_operand.vmem [shape: f32[256,512], index: 3, kind: input, shape index: {}]   ;;  %s2319_s4 = inlined_call_operand.vmem [shape: f32[1,512], index: 4, kind: input, shape index: {}]   ;;  %s2320_s5 = inlined_call_operand.vmem [shape: f32[128,128], index: 5, kind: input, shape index: {}]   ;;  %s2321_s6 = inlined_call_operand.vmem [shape: f32[1,128], index: 6, kind: input, shape index: {}]   ;;  %s2322_s7 = inlined_call_operand.vmem [shape: f32[8,8,128], index: 7, kind: output, shape index: {0}]   ;;  %s2323_s8 = inlined_call_operand.vmem [shape: f32[8,128], index: 8, kind: output, shape index: {1}]  }
   0x1   :  { %s1629_s29 = smov 0  }
   0x2 LB: > { %s28_s30 = sadd.s32 1, %s1569_s28  ;;  %p1198_p0 = scmp.ge.s32.totalorder %s1573_s29, 1  ;;  %s1573_s29 = sphi %s1629_s29, %s19_s29   ;;  %s1569_s28 = sphi %s1627_s28, %s2325_s28   ;;  %s1565_s27 = sphi %s1625_s27, %s2324_s27  }
   0x3   : > { %p29_p1 = scmp.ge.s32.totalorder %s28_s30, 8  ;;  %p299_p2 = scmp.lt.s32.totalorder %s1573_s29, 9 }
   0x5   : > { %s2327_s30 = smov (%p29_p1, %s28_s30), 0  ;;  %p300_p3 = pnand %p1198_p0, %p299_p2 }
   0x6   : > { %p350_p4 = scmp.lt.s32.totalorder (!%p300_p3), %s1565_s27, 7  ;;  %p1203_p5 = scmp.ne.s32.totalorder (!%p300_p3), %s1565_s27, 0 }
   0x7   : > { %303 = sbr.rel (%p300_p3) target bundleno = 835 (0x343), region = 48 }
   0xe   : > { %s351_s9 = scalar_select %p350_p4, %s1565_s27, 7 }
   0xf   : > { %380 = sbr.rel (%p1203_p5) target bundleno = 22 (0x16), region = 52  ;;  %v1575_v0 = vmov (!%p1203_p5), 0.0   ;;  %v1576_v1 = vmov (!%p1203_p5), -inf  }
  0x10   : > { %s1215_s10 = sshll.u32 %s351_s9, 5  ;;  %s1201_s11 = sshll.u32 %s351_s9, 3  ;;  %381 = vst [vmem:[#allocation2] sm:$0xff] (!%p1203_p5), %v1575_v0  ;;  %382 = vst [vmem:[#allocation2 + $0x8] sm:$0xff] (!%p1203_p5), %v1575_v0 }
  0x11   : > { %s1650_s14 = scalar_lea.vmem %s2315_s0, %s1215_s10  ;;  %s1655_s17 = scalar_lea.vmem %s2316_s1, %s1201_s11  ;;  %383 = vst [vmem:[#allocation3] sm:$0xff] (!%p1203_p5), %v1575_v0  ;;  %384 = vst [vmem:[#allocation4] sm:$0xff] (!%p1203_p5), %v1575_v0 }
  0x12   : > { %s1660_s20 = scalar_lea.vmem %s2322_s7, %s1201_s11  ;;  %386 = vst [vmem:[#allocation6] sm:$0xff] (!%p1203_p5), %v1575_v0  ;;  %385 = vst [vmem:[#allocation5] sm:$0xff] (!%p1203_p5), %v1576_v1 }
  0x16 PF: > { %v393_v2 = vld [vmem:[%s2317_s2 + $0x8] sm:$0xff]  ;;  %v392_v4 = vld [vmem:[%s2317_s2] sm:$0xff]  ;;  %v1577_v9 = vmov 0.0   ;;  %v395_v21 = vld [vmem:[%s2317_s2 + $0x18] sm:$0xff]  ;;  %vm1579_vm0 = vmmov 0   ;;  %p1211_p6 = scmp.ne.s32.totalorder %s1565_s27, 7 }
  0x17   : > { %v397_v3 = vld [vmem:[%s2317_s2 + $0x28] sm:$0xff]  ;;  %v396_v6 = vld [vmem:[%s2317_s2 + $0x20] sm:$0xff]  ;;  %520 = vmatprep.mubr.f32.mxu0 %v1577_v9  ;;  %591 = vmatprep.mubr.f32.mxu1 %v1577_v9  ;;  %v399_v22 = vld [vmem:[%s2317_s2 + $0x38] sm:$0xff] }
  0x18   : > { %v1268_v5 = vpack.c.bf16 %v397_v3, %v393_v2  ;;  %v401_v7 = vld [vmem:[%s2317_s2 + $0x48] sm:$0xff]  ;;  %v1270_v10 = vpack.c.bf16 %v396_v6, %v392_v4  ;;  %v400_v12 = vld [vmem:[%s2317_s2 + $0x40] sm:$0xff]  ;;  %v1300_v24 = vpack.c.bf16 %v399_v22, %v395_v21  ;;  %v394_v25 = vld [vmem:[%s2317_s2 + $0x10] sm:$0xff] }
  0x19   : > { %v405_v8 = vld [vmem:[%s2317_s2 + $0x68] sm:$0xff]  ;;  %v404_v13 = vld [vmem:[%s2317_s2 + $0x60] sm:$0xff]  ;;  %v398_v26 = vld [vmem:[%s2317_s2 + $0x30] sm:$0xff] }
  0x1a   : > { %v1272_v11 = vpack.c.bf16 %v405_v8, %v401_v7  ;;  %v409_v14 = vld [vmem:[%s2317_s2 + $0x88] sm:$0xff]  ;;  %1269 = vmatprep.subr.bf16.mxu0 %v1268_v5  ;;  %v1274_v16 = vpack.c.bf16 %v404_v13, %v400_v12  ;;  %v408_v17 = vld [vmem:[%s2317_s2 + $0x80] sm:$0xff]  ;;  %v1302_v27 = vpack.c.bf16 %v398_v26, %v394_v25  ;;  %1301 = vmatprep.subr.bf16.mxu1 %v1300_v24  ;;  %v403_v29 = vld [vmem:[%s2317_s2 + $0x58] sm:$0xff] }
  0x1b   : > { %v413_v15 = vld [vmem:[%s2317_s2 + $0xa8] sm:$0xff]  ;;  %1271 = vmatpush1.bf16.msra.mxu0 %v1270_v10  ;;  %v412_v18 = vld [vmem:[%s2317_s2 + $0xa0] sm:$0xff]  ;;  %v407_v30 = vld [vmem:[%s2317_s2 + $0x78] sm:$0xff] }
  0x1c   : > { %1273 = vmatprep.subr.bf16.mxu0 %v1272_v11  ;;  %v1276_v19 = vpack.c.bf16 %v413_v15, %v409_v14  ;;  %v417_v20 = vld [vmem:[%s2317_s2 + $0xc8] sm:$0xff]  ;;  %v1278_v28 = vpack.c.bf16 %v412_v18, %v408_v17  ;;  %v402_v31 = vld [vmem:[%s2317_s2 + $0x50] sm:$0xff]  ;;  %v416_v33 = vld [vmem:[%s2317_s2 + $0xc0] sm:$0xff]  ;;  %1303 = vmatpush1.bf16.msra.mxu1 %v1302_v27  ;;  %v1304_v35 = vpack.c.bf16 %v407_v30, %v403_v29 }
  0x1d   : > { %v421_v23 = vld [vmem:[%s2317_s2 + $0xe8] sm:$0xff]  ;;  %v420_v34 = vld [vmem:[%s2317_s2 + $0xe0] sm:$0xff]  ;;  %v406_v36 = vld [vmem:[%s2317_s2 + $0x70] sm:$0xff] }
  0x1e   : > { %v1280_v32 = vpack.c.bf16 %v421_v23, %v417_v20  ;;  %v425_v37 = vld [vmem:[%s2317_s2 + $0x108] sm:$0xff]  ;;  %v1306_v39 = vpack.c.bf16 %v406_v36, %v402_v31  ;;  %v411_v40 = vld [vmem:[%s2317_s2 + $0x98] sm:$0xff]  ;;  %1305 = vmatprep.subr.bf16.mxu1 %v1304_v35  ;;  %v410_v42 = vld [vmem:[%s2317_s2 + $0x90] sm:$0xff]  ;;  %v1282_v44 = vpack.c.bf16 %v420_v34, %v416_v33 }
  0x1f   : > { %1275 = vmatpush1.bf16.msra.mxu0 %v1274_v16  ;;  %v429_v38 = vld [vmem:[%s2317_s2 + $0x128] sm:$0xff]  ;;  %v415_v41 = vld [vmem:[%s2317_s2 + $0xb8] sm:$0xff]  ;;  %v414_v43 = vld [vmem:[%s2317_s2 + $0xb0] sm:$0xff] }
  0x20   : > { %1277 = vmatprep.subr.bf16.mxu0 %v1276_v19  ;;  %v424_v45 = vld [vmem:[%s2317_s2 + $0x100] sm:$0xff]  ;;  %v1308_v47 = vpack.c.bf16 %v415_v41, %v411_v40  ;;  %v1284_v48 = vpack.c.bf16 %v429_v38, %v425_v37  ;;  %1307 = vmatpush1.bf16.msra.mxu1 %v1306_v39  ;;  %v433_v49 = vld [vmem:[%s2317_s2 + $0x148] sm:$0xff]  ;;  %v1310_v50 = vpack.c.bf16 %v414_v43, %v410_v42  ;;  %v419_v51 = vld [vmem:[%s2317_s2 + $0xd8] sm:$0xff] }
  0x21   : > { %v428_v46 = vld [vmem:[%s2317_s2 + $0x120] sm:$0xff]  ;;  %v423_v52 = vld [vmem:[%s2317_s2 + $0xf8] sm:$0xff]  ;;  %v437_v53 = vld [vmem:[%s2317_s2 + $0x168] sm:$0xff] }
  0x22   : > { %1309 = vmatprep.subr.bf16.mxu1 %v1308_v47  ;;  %v1312_v54 = vpack.c.bf16 %v423_v52, %v419_v51  ;;  %v418_v55 = vld [vmem:[%s2317_s2 + $0xd0] sm:$0xff]  ;;  %v1286_v57 = vpack.c.bf16 %v428_v46, %v424_v45  ;;  %v427_v58 = vld [vmem:[%s2317_s2 + $0x118] sm:$0xff]  ;;  %v1288_v60 = vpack.c.bf16 %v437_v53, %v433_v49  ;;  %v432_v61 = vld [vmem:[%s2317_s2 + $0x140] sm:$0xff] }
  0x23   : > { %1279 = vmatpush1.bf16.msra.mxu0 %v1278_v28  ;;  %v422_v56 = vld [vmem:[%s2317_s2 + $0xf0] sm:$0xff]  ;;  %v431_v59 = vld [vmem:[%s2317_s2 + $0x138] sm:$0xff]  ;;  %v436_v62 = vld [vmem:[%s2317_s2 + $0x160] sm:$0xff] }
  0x24   : > { %1281 = vmatprep.subr.bf16.mxu0 %v1280_v32  ;;  %1311 = vmatpush1.bf16.msra.mxu1 %v1310_v50  ;;  %v441_v63 = vld [vmem:[%s2317_s2 + $0x188] sm:$0xff]  ;;  %v1314_v0 = vpack.c.bf16 %v422_v56, %v418_v55  ;;  %v1316_v2 = vpack.c.bf16 %v431_v59, %v427_v58  ;;  %v426_v3 = vld [vmem:[%s2317_s2 + $0x110] sm:$0xff]  ;;  %v435_v5 = vld [vmem:[%s2317_s2 + $0x158] sm:$0xff]  ;;  %v1290_v7 = vpack.c.bf16 %v436_v62, %v432_v61 }
  0x25   : > { %v445_v1 = vld [vmem:[%s2317_s2 + $0x1a8] sm:$0xff]  ;;  %1313 = vmatprep.subr.bf16.mxu1 %v1312_v54  ;;  %v430_v4 = vld [vmem:[%s2317_s2 + $0x130] sm:$0xff]  ;;  %v439_v6 = vld [vmem:[%s2317_s2 + $0x178] sm:$0xff] }
  0x26   : > { %v1292_v8 = vpack.c.bf16 %v445_v1, %v441_v63  ;;  %v440_v10 = vld [vmem:[%s2317_s2 + $0x180] sm:$0xff]  ;;  %v449_v12 = vld [vmem:[%s2317_s2 + $0x1c8] sm:$0xff]  ;;  %v1318_v13 = vpack.c.bf16 %v430_v4, %v426_v3  ;;  %v1320_v15 = vpack.c.bf16 %v439_v6, %v435_v5  ;;  %v434_v16 = vld [vmem:[%s2317_s2 + $0x150] sm:$0xff] }
  0x27   : > { %1283 = vmatpush1.bf16.msra.mxu0 %v1282_v44  ;;  %v444_v11 = vld [vmem:[%s2317_s2 + $0x1a0] sm:$0xff]  ;;  %v453_v14 = vld [vmem:[%s2317_s2 + $0x1e8] sm:$0xff]  ;;  %v438_v17 = vld [vmem:[%s2317_s2 + $0x170] sm:$0xff] }
  0x28   : > { %1285 = vmatprep.subr.bf16.mxu0 %v1284_v48  ;;  %1315 = vmatpush1.bf16.msra.mxu1 %v1314_v0  ;;  %v443_v18 = vld [vmem:[%s2317_s2 + $0x198] sm:$0xff]  ;;  %v1294_v20 = vpack.c.bf16 %v444_v11, %v440_v10  ;;  %v1296_v21 = vpack.c.bf16 %v453_v14, %v449_v12  ;;  %v448_v22 = vld [vmem:[%s2317_s2 + $0x1c0] sm:$0xff]  ;;  %v1322_v24 = vpack.c.bf16 %v438_v17, %v434_v16  ;;  %v442_v25 = vld [vmem:[%s2317_s2 + $0x190] sm:$0xff] }
  0x29   : > { %1317 = vmatprep.subr.bf16.mxu1 %v1316_v2  ;;  %v447_v19 = vld [vmem:[%s2317_s2 + $0x1b8] sm:$0xff]  ;;  %v452_v23 = vld [vmem:[%s2317_s2 + $0x1e0] sm:$0xff]  ;;  %v446_v27 = vld [vmem:[%s2317_s2 + $0x1b0] sm:$0xff] }
  0x2a   : > { %v1324_v26 = vpack.c.bf16 %v447_v19, %v443_v18  ;;  %v632_v28 = vld [vmem:[%s2318_s3 + $0x8] sm:$0xff]  ;;  %v451_v30 = vld [vmem:[%s2317_s2 + $0x1d8] sm:$0xff]  ;;  %v1298_v32 = vpack.c.bf16 %v452_v23, %v448_v22  ;;  %v1326_v33 = vpack.c.bf16 %v446_v27, %v442_v25  ;;  %v450_v34 = vld [vmem:[%s2317_s2 + $0x1d0] sm:$0xff] }
  0x2b   : > { %1287 = vmatpush1.bf16.msra.mxu0 %v1286_v57  ;;  %v636_v29 = vld [vmem:[%s2318_s3 + $0x28] sm:$0xff]  ;;  %v455_v31 = vld [vmem:[%s2317_s2 + $0x1f8] sm:$0xff]  ;;  %v631_v36 = vld [vmem:[%s2318_s3] sm:$0xff] }
  0x2c   : > { %1289 = vmatprep.subr.bf16.mxu0 %v1288_v60  ;;  %1319 = vmatpush1.bf16.msra.mxu1 %v1318_v13  ;;  %v1332_v35 = vpack.c.bf16 %v636_v29, %v632_v28  ;;  %v635_v37 = vld [vmem:[%s2318_s3 + $0x20] sm:$0xff]  ;;  %v1328_v38 = vpack.c.bf16 %v455_v31, %v451_v30  ;;  %v454_v39 = vld [vmem:[%s2317_s2 + $0x1f0] sm:$0xff]  ;;  %v640_v40 = vld [vmem:[%s2318_s3 + $0x48] sm:$0xff] }
  0x2d   : > { %1321 = vmatprep.subr.bf16.mxu1 %v1320_v15  ;;  %v644_v41 = vld [vmem:[%s2318_s3 + $0x68] sm:$0xff]  ;;  %v634_v42 = vld [vmem:[%s2318_s3 + $0x18] sm:$0xff]  ;;  %v387_v44 = vld [vmem:[#allocation2] sm:$0xff]  ;;  %v1334_v45 = vpack.c.bf16 %v635_v37, %v631_v36  ;;  %v1330_v46 = vpack.c.bf16 %v454_v39, %v450_v34 }
  0x2e   : > { %v638_v43 = vld [vmem:[%s2318_s3 + $0x38] sm:$0xff]  ;;  %v633_v47 = vld [vmem:[%s2318_s3 + $0x10] sm:$0xff]  ;;  %v1336_v48 = vpack.c.bf16 %v644_v41, %v640_v40  ;;  %v639_v49 = vld [vmem:[%s2318_s3 + $0x40] sm:$0xff] }
  0x2f   : > { %1291 = vmatpush1.bf16.msra.mxu0 %v1290_v7  ;;  %v643_v50 = vld [vmem:[%s2318_s3 + $0x60] sm:$0xff]  ;;  %v1396_v51 = vpack.c.bf16 %v638_v43, %v634_v42  ;;  %v637_v52 = vld [vmem:[%s2318_s3 + $0x30] sm:$0xff]  ;;  %v648_v53 = vld [vmem:[%s2318_s3 + $0x88] sm:$0xff] }
  0x30   : > { %1293 = vmatprep.subr.bf16.mxu0 %v1292_v8  ;;  %1323 = vmatpush1.bf16.msra.mxu1 %v1322_v24  ;;  %v652_v54 = vld [vmem:[%s2318_s3 + $0xa8] sm:$0xff]  ;;  %v642_v55 = vld [vmem:[%s2318_s3 + $0x58] sm:$0xff]  ;;  %v1338_v57 = vpack.c.bf16 %v643_v50, %v639_v49  ;;  %v1398_v58 = vpack.c.bf16 %v637_v52, %v633_v47  ;;  %v641_v61 = vld [vmem:[%s2318_s3 + $0x50] sm:$0xff] }
  0x31   : > { %1325 = vmatprep.subr.bf16.mxu1 %v1324_v26  ;;  %v646_v56 = vld [vmem:[%s2318_s3 + $0x78] sm:$0xff]  ;;  %v1340_v59 = vpack.c.bf16 %v652_v54, %v648_v53  ;;  %v645_v62 = vld [vmem:[%s2318_s3 + $0x70] sm:$0xff]  ;;  %v647_v3 = vld [vmem:[%s2318_s3 + $0x80] sm:$0xff] }
  0x32   : > { %v1400_v60 = vpack.c.bf16 %v646_v56, %v642_v55  ;;  %v650_v63 = vld [vmem:[%s2318_s3 + $0x98] sm:$0xff]  ;;  %v1402_v1 = vpack.c.bf16 %v645_v62, %v641_v61  ;;  %v651_v4 = vld [vmem:[%s2318_s3 + $0xa0] sm:$0xff]  ;;  %v649_v5 = vld [vmem:[%s2318_s3 + $0x90] sm:$0xff] }
  0x33   : > { %1295 = vmatpush1.bf16.msra.mxu0 %v1294_v20  ;;  %v654_v0 = vld [vmem:[%s2318_s3 + $0xb8] sm:$0xff]  ;;  %v1342_v6 = vpack.c.bf16 %v651_v4, %v647_v3  ;;  %v653_v7 = vld [vmem:[%s2318_s3 + $0xb0] sm:$0xff]  ;;  %v656_v10 = vld [vmem:[%s2318_s3 + $0xc8] sm:$0xff] }
  0x34   : > { %1297 = vmatprep.subr.bf16.mxu0 %v1296_v21  ;;  %1327 = vmatpush1.bf16.msra.mxu1 %v1326_v33  ;;  %v1404_v2 = vpack.c.bf16 %v654_v0, %v650_v63  ;;  %v1406_v8 = vpack.c.bf16 %v653_v7, %v649_v5  ;;  %v660_v11 = vld [vmem:[%s2318_s3 + $0xe8] sm:$0xff]  ;;  %v658_v12 = vld [vmem:[%s2318_s3 + $0xd8] sm:$0xff]  ;;  %v655_v15 = vld [vmem:[%s2318_s3 + $0xc0] sm:$0xff] }
  0x35   : > { %1329 = vmatprep.subr.bf16.mxu1 %v1328_v38  ;;  %v1344_v13 = vpack.c.bf16 %v660_v11, %v656_v10  ;;  %v662_v14 = vld [vmem:[%s2318_s3 + $0xf8] sm:$0xff]  ;;  %v659_v16 = vld [vmem:[%s2318_s3 + $0xe0] sm:$0xff]  ;;  %v657_v19 = vld [vmem:[%s2318_s3 + $0xd0] sm:$0xff] }
  0x36   : > { %v1408_v17 = vpack.c.bf16 %v662_v14, %v658_v12  ;;  %v1346_v18 = vpack.c.bf16 %v659_v16, %v655_v15  ;;  %v661_v20 = vld [vmem:[%s2318_s3 + $0xf0] sm:$0xff]  ;;  %v664_v22 = vld [vmem:[%s2318_s3 + $0x108] sm:$0xff]  ;;  %v666_v24 = vld [vmem:[%s2318_s3 + $0x118] sm:$0xff] }
  0x37   : > { %1299 = vmatpush1.bf16.msra.mxu0 %v1298_v32  ;;  %v1410_v21 = vpack.c.bf16 %v661_v20, %v657_v19  ;;  %v668_v23 = vld [vmem:[%s2318_s3 + $0x128] sm:$0xff]  ;;  %v670_v26 = vld [vmem:[%s2318_s3 + $0x138] sm:$0xff]  ;;  %v663_v27 = vld [vmem:[%s2318_s3 + $0x100] sm:$0xff] }
  0x38   : > { %1333 = vmatprep.subr.bf16.mxu0 %v1332_v35  ;;  %1331 = vmatpush1.bf16.msra.mxu1 %v1330_v46  ;;  %v1348_v25 = vpack.c.bf16 %v668_v23, %v664_v22  ;;  %v667_v28 = vld [vmem:[%s2318_s3 + $0x120] sm:$0xff]  ;;  %v1412_v29 = vpack.c.bf16 %v670_v26, %v666_v24  ;;  %v665_v31 = vld [vmem:[%s2318_s3 + $0x110] sm:$0xff]  ;;  %v672_v34 = vld [vmem:[%s2318_s3 + $0x148] sm:$0xff] }
  0x39   : > { %1397 = vmatprep.subr.bf16.mxu1 %v1396_v51  ;;  %v1350_v30 = vpack.c.bf16 %v667_v28, %v663_v27  ;;  %v669_v32 = vld [vmem:[%s2318_s3 + $0x130] sm:$0xff]  ;;  %v676_v35 = vld [vmem:[%s2318_s3 + $0x168] sm:$0xff]  ;;  %v674_v36 = vld [vmem:[%s2318_s3 + $0x158] sm:$0xff] }
  0x3a   : > { %521 = vmatmul.mubr.f32.vlgmr.msra.gmra.mrb[0].mxu0 %v387_v44  ;;  %v1414_v33 = vpack.c.bf16 %v669_v32, %v665_v31  ;;  %v1352_v37 = vpack.c.bf16 %v676_v35, %v672_v34  ;;  %v678_v38 = vld [vmem:[%s2318_s3 + $0x178] sm:$0xff]  ;;  %v671_v39 = vld [vmem:[%s2318_s3 + $0x140] sm:$0xff]  ;;  %v673_v42 = vld [vmem:[%s2318_s3 + $0x150] sm:$0xff] }
  0x3b   : > { %1335 = vmatpush1.bf16.msra.mxu0 %v1334_v45  ;;  %592 = vmatmul.mubr.f32.vlgmr.msra.gmra.mrb[0].mxu1 %v387_v44  ;;  %v1416_v40 = vpack.c.bf16 %v678_v38, %v674_v36  ;;  %v675_v41 = vld [vmem:[%s2318_s3 + $0x160] sm:$0xff]  ;;  %v677_v43 = vld [vmem:[%s2318_s3 + $0x170] sm:$0xff]  ;;  %v680_v46 = vld [vmem:[%s2318_s3 + $0x188] sm:$0xff] }
  0x3c   : > { %1337 = vmatprep.subr.bf16.mxu0 %v1336_v48  ;;  %1399 = vmatpush1.bf16.msra.mxu1 %v1398_v58  ;;  %v1354_v44 = vpack.c.bf16 %v675_v41, %v671_v39  ;;  %v1418_v45 = vpack.c.bf16 %v677_v43, %v673_v42  ;;  %v684_v47 = vld [vmem:[%s2318_s3 + $0x1a8] sm:$0xff]  ;;  %v682_v48 = vld [vmem:[%s2318_s3 + $0x198] sm:$0xff]  ;;  %v679_v51 = vld [vmem:[%s2318_s3 + $0x180] sm:$0xff] }
  0x3d   : > { %1401 = vmatprep.subr.bf16.mxu1 %v1400_v60  ;;  %v1356_v49 = vpack.c.bf16 %v684_v47, %v680_v46  ;;  %v686_v50 = vld [vmem:[%s2318_s3 + $0x1b8] sm:$0xff]  ;;  %v683_v52 = vld [vmem:[%s2318_s3 + $0x1a0] sm:$0xff]  ;;  %v681_v55 = vld [vmem:[%s2318_s3 + $0x190] sm:$0xff] }
  0x3e   : > { %v1420_v53 = vpack.c.bf16 %v686_v50, %v682_v48  ;;  %v1358_v54 = vpack.c.bf16 %v683_v52, %v679_v51  ;;  %v685_v56 = vld [vmem:[%s2318_s3 + $0x1b0] sm:$0xff]  ;;  %v688_v58 = vld [vmem:[%s2318_s3 + $0x1c8] sm:$0xff]  ;;  %v690_v60 = vld [vmem:[%s2318_s3 + $0x1d8] sm:$0xff] }
  0x3f   : > { %1339 = vmatpush1.bf16.msra.mxu0 %v1338_v57  ;;  %v1422_v57 = vpack.c.bf16 %v685_v56, %v681_v55  ;;  %v694_v62 = vld [vmem:[%s2318_s3 + $0x1f8] sm:$0xff]  ;;  %v687_v63 = vld [vmem:[%s2318_s3 + $0x1c0] sm:$0xff]  ;;  %v689_v3 = vld [vmem:[%s2318_s3 + $0x1d0] sm:$0xff] }
  0x40   : > { %1341 = vmatprep.subr.bf16.mxu0 %v1340_v59  ;;  %1403 = vmatpush1.bf16.msra.mxu1 %v1402_v1  ;;  %v692_v59 = vld [vmem:[%s2318_s3 + $0x1e8] sm:$0xff]  ;;  %v691_v0 = vld [vmem:[%s2318_s3 + $0x1e0] sm:$0xff]  ;;  %v1424_v1 = vpack.c.bf16 %v694_v62, %v690_v60  ;;  %v693_v4 = vld [vmem:[%s2318_s3 + $0x1f0] sm:$0xff] }
  0x41   : > { %1405 = vmatprep.subr.bf16.mxu1 %v1404_v2  ;;  %v1360_v61 = vpack.c.bf16 %v692_v59, %v688_v58  ;;  %v1362_v2 = vpack.c.bf16 %v691_v0, %v687_v63  ;;  %v1426_v5 = vpack.c.bf16 %v693_v4, %v689_v3  ;;  %v700_v7 = vld [vmem:[%s2318_s3 + $0x228] sm:$0xff]  ;;  %v702_v11 = vld [vmem:[%s2318_s3 + $0x238] sm:$0xff]  ;;  %v695_v12 = vld [vmem:[%s2318_s3 + $0x200] sm:$0xff] }
  0x42   : > { %v697_v16 = vld [vmem:[%s2318_s3 + $0x210] sm:$0xff]  ;;  %v704_v19 = vld [vmem:[%s2318_s3 + $0x248] sm:$0xff]  ;;  %v710_v23 = vld [vmem:[%s2318_s3 + $0x278] sm:$0xff] }
  0x43   : > { %1343 = vmatpush1.bf16.msra.mxu0 %v1342_v6  ;;  %v696_v6 = vld [vmem:[%s2318_s3 + $0x208] sm:$0xff]  ;;  %v703_v24 = vld [vmem:[%s2318_s3 + $0x240] sm:$0xff]  ;;  %v705_v28 = vld [vmem:[%s2318_s3 + $0x250] sm:$0xff] }
  0x44   : > { %1407 = vmatpush1.bf16.msra.mxu1 %v1406_v8  ;;  %1345 = vmatprep.subr.bf16.mxu0 %v1344_v13  ;;  %v698_v8 = vld [vmem:[%s2318_s3 + $0x218] sm:$0xff]  ;;  %v1364_v10 = vpack.c.bf16 %v700_v7, %v696_v6  ;;  %v699_v13 = vld [vmem:[%s2318_s3 + $0x220] sm:$0xff]  ;;  %v708_v20 = vld [vmem:[%s2318_s3 + $0x268] sm:$0xff] }
  0x45   : > { %1409 = vmatprep.subr.bf16.mxu1 %v1408_v17  ;;  %v1428_v14 = vpack.c.bf16 %v702_v11, %v698_v8  ;;  %v1366_v15 = vpack.c.bf16 %v699_v13, %v695_v12  ;;  %v701_v17 = vld [vmem:[%s2318_s3 + $0x230] sm:$0xff]  ;;  %v1368_v22 = vpack.c.bf16 %v708_v20, %v704_v19  ;;  %v712_v31 = vld [vmem:[%s2318_s3 + $0x288] sm:$0xff]  ;;  %v718_v35 = vld [vmem:[%s2318_s3 + $0x2b8] sm:$0xff] }
  0x46   : > { %v716_v32 = vld [vmem:[%s2318_s3 + $0x2a8] sm:$0xff]  ;;  %v711_v36 = vld [vmem:[%s2318_s3 + $0x280] sm:$0xff]  ;;  %v717_v41 = vld [vmem:[%s2318_s3 + $0x2b0] sm:$0xff] }
  0x47   : > { %1347 = vmatpush1.bf16.msra.mxu0 %v1346_v18  ;;  %v1430_v18 = vpack.c.bf16 %v701_v17, %v697_v16  ;;  %v1372_v34 = vpack.c.bf16 %v716_v32, %v712_v31  ;;  %v720_v43 = vld [vmem:[%s2318_s3 + $0x2c8] sm:$0xff]  ;;  %v726_v47 = vld [vmem:[%s2318_s3 + $0x2f8] sm:$0xff]  ;;  %v719_v48 = vld [vmem:[%s2318_s3 + $0x2c0] sm:$0xff] }
  0x48   : > { %1411 = vmatpush1.bf16.msra.mxu1 %v1410_v21  ;;  %1349 = vmatprep.subr.bf16.mxu0 %v1348_v25  ;;  %v706_v21 = vld [vmem:[%s2318_s3 + $0x258] sm:$0xff]  ;;  %v707_v25 = vld [vmem:[%s2318_s3 + $0x260] sm:$0xff]  ;;  %v721_v52 = vld [vmem:[%s2318_s3 + $0x2d0] sm:$0xff] }
  0x49   : > { %1413 = vmatprep.subr.bf16.mxu1 %v1412_v29  ;;  %v1432_v26 = vpack.c.bf16 %v710_v23, %v706_v21  ;;  %v1370_v27 = vpack.c.bf16 %v707_v25, %v703_v24  ;;  %v709_v29 = vld [vmem:[%s2318_s3 + $0x270] sm:$0xff]  ;;  %v728_v55 = vld [vmem:[%s2318_s3 + $0x308] sm:$0xff]  ;;  %v734_v59 = vld [vmem:[%s2318_s3 + $0x338] sm:$0xff] }
  0x4a   : > { %v732_v56 = vld [vmem:[%s2318_s3 + $0x328] sm:$0xff]  ;;  %v727_v60 = vld [vmem:[%s2318_s3 + $0x300] sm:$0xff]  ;;  %v729_v0 = vld [vmem:[%s2318_s3 + $0x310] sm:$0xff] }
  0x4b   : > { %1351 = vmatpush1.bf16.msra.mxu0 %v1350_v30  ;;  %v1434_v30 = vpack.c.bf16 %v709_v29, %v705_v28  ;;  %v1380_v58 = vpack.c.bf16 %v732_v56, %v728_v55  ;;  %v736_v3 = vld [vmem:[%s2318_s3 + $0x348] sm:$0xff]  ;;  %v742_v7 = vld [vmem:[%s2318_s3 + $0x378] sm:$0xff]  ;;  %v735_v8 = vld [vmem:[%s2318_s3 + $0x340] sm:$0xff] }
  0x4c   : > { %1415 = vmatpush1.bf16.msra.mxu1 %v1414_v33  ;;  %1353 = vmatprep.subr.bf16.mxu0 %v1352_v37  ;;  %v714_v33 = vld [vmem:[%s2318_s3 + $0x298] sm:$0xff]  ;;  %v715_v37 = vld [vmem:[%s2318_s3 + $0x2a0] sm:$0xff]  ;;  %v740_v4 = vld [vmem:[%s2318_s3 + $0x368] sm:$0xff] }
  0x4d   : > { %1417 = vmatprep.subr.bf16.mxu1 %v1416_v40  ;;  %v1436_v38 = vpack.c.bf16 %v718_v35, %v714_v33  ;;  %v1374_v39 = vpack.c.bf16 %v715_v37, %v711_v36  ;;  %v713_v40 = vld [vmem:[%s2318_s3 + $0x290] sm:$0xff]  ;;  %v1384_v6 = vpack.c.bf16 %v740_v4, %v736_v3  ;;  %v744_v16 = vld [vmem:[%s2318_s3 + $0x388] sm:$0xff]  ;;  %v750_v20 = vld [vmem:[%s2318_s3 + $0x3b8] sm:$0xff] }
  0x4e   : > { %v1438_v42 = vpack.c.bf16 %v717_v41, %v713_v40  ;;  %v737_v13 = vld [vmem:[%s2318_s3 + $0x350] sm:$0xff]  ;;  %v748_v17 = vld [vmem:[%s2318_s3 + $0x3a8] sm:$0xff]  ;;  %v743_v21 = vld [vmem:[%s2318_s3 + $0x380] sm:$0xff] }
  0x4f   : > { %1355 = vmatpush1.bf16.msra.mxu0 %v1354_v44  ;;  %v724_v44 = vld [vmem:[%s2318_s3 + $0x2e8] sm:$0xff]  ;;  %v1388_v19 = vpack.c.bf16 %v748_v17, %v744_v16  ;;  %v745_v25 = vld [vmem:[%s2318_s3 + $0x390] sm:$0xff]  ;;  %v758_v32 = vld [vmem:[%s2318_s3 + $0x3f8] sm:$0xff] }
  0x50   : > { %1419 = vmatpush1.bf16.msra.mxu1 %v1418_v45  ;;  %1357 = vmatprep.subr.bf16.mxu0 %v1356_v49  ;;  %v722_v45 = vld [vmem:[%s2318_s3 + $0x2d8] sm:$0xff]  ;;  %v1376_v46 = vpack.c.bf16 %v724_v44, %v720_v43  ;;  %v723_v49 = vld [vmem:[%s2318_s3 + $0x2e0] sm:$0xff]  ;;  %v752_v28 = vld [vmem:[%s2318_s3 + $0x3c8] sm:$0xff] }
  0x51   : > { %1421 = vmatprep.subr.bf16.mxu1 %v1420_v53  ;;  %v1440_v50 = vpack.c.bf16 %v726_v47, %v722_v45  ;;  %v1378_v51 = vpack.c.bf16 %v723_v49, %v719_v48  ;;  %v725_v53 = vld [vmem:[%s2318_s3 + $0x2f0] sm:$0xff]  ;;  %v756_v29 = vld [vmem:[%s2318_s3 + $0x3e8] sm:$0xff]  ;;  %v751_v33 = vld [vmem:[%s2318_s3 + $0x3c0] sm:$0xff] }
  0x52   : > { %v1392_v31 = vpack.c.bf16 %v756_v29, %v752_v28  ;;  %v753_v37 = vld [vmem:[%s2318_s3 + $0x3d0] sm:$0xff]  ;;  %v630_v40 = vld [vmem:[#allocation2 + $0x8] sm:$0xff]  ;;  %v388_v41 = vld [vmem:[%s1650_s14] sm:$0xff] }
  0x53   : > { %1359 = vmatpush1.bf16.msra.mxu0 %v1358_v54  ;;  %v1442_v54 = vpack.c.bf16 %v725_v53, %v721_v52  ;;  %845 = vmatprep.mubr.f32.mxu0 %v630_v40  ;;  %v391_v49 = vld [vmem:[%s1650_s14 + $0x18] sm:$0xff]  ;;  %v390_v53 = vld [vmem:[%s1650_s14 + $0x10] sm:$0xff]  ;;  %v954_v16 = vld [vmem:[%s2320_s5 + $0x20] sm:$0xff] }
  0x54   : > { %1423 = vmatpush1.bf16.msra.mxu1 %v1422_v57  ;;  %1361 = vmatprep.subr.bf16.mxu0 %v1360_v61  ;;  %v730_v57 = vld [vmem:[%s2318_s3 + $0x318] sm:$0xff]  ;;  %v731_v61 = vld [vmem:[%s2318_s3 + $0x320] sm:$0xff]  ;;  %v955_v17 = vld [vmem:[%s2320_s5 + $0x28] sm:$0xff] }
  0x55   : > { %1425 = vmatprep.subr.bf16.mxu1 %v1424_v1  ;;  %v1444_v62 = vpack.c.bf16 %v734_v59, %v730_v57  ;;  %v1382_v63 = vpack.c.bf16 %v731_v61, %v727_v60  ;;  %v733_v1 = vld [vmem:[%s2318_s3 + $0x330] sm:$0xff]  ;;  %916 = vmatprep.mubr.f32.mxu1 %v630_v40  ;;  %v963_v29 = vld [vmem:[%s2320_s5 + $0x68] sm:$0xff] }
  0x57   : > { %1363 = vmatpush1.bf16.msra.mxu0 %v1362_v2  ;;  %v1446_v2 = vpack.c.bf16 %v733_v1, %v729_v0 }
  0x58   : > { %1427 = vmatpush1.bf16.msra.mxu1 %v1426_v5  ;;  %1365 = vmatprep.subr.bf16.mxu0 %v1364_v10  ;;  %v738_v5 = vld [vmem:[%s2318_s3 + $0x358] sm:$0xff]  ;;  %v739_v10 = vld [vmem:[%s2318_s3 + $0x360] sm:$0xff] }
  0x59   : > { %1429 = vmatprep.subr.bf16.mxu1 %v1428_v14  ;;  %v1448_v11 = vpack.c.bf16 %v742_v7, %v738_v5  ;;  %v1386_v12 = vpack.c.bf16 %v739_v10, %v735_v8  ;;  %v741_v14 = vld [vmem:[%s2318_s3 + $0x370] sm:$0xff]  ;;  %v950_v8 = vld [vmem:[%s2320_s5] sm:$0xff]  ;;  %v951_v10 = vld [vmem:[%s2320_s5 + $0x8] sm:$0xff] }
  0x5b   : > { %1367 = vmatpush1.bf16.msra.mxu0 %v1366_v15  ;;  %v1450_v15 = vpack.c.bf16 %v741_v14, %v737_v13  ;;  %v952_v13 = vld [vmem:[%s2320_s5 + $0x10] sm:$0xff]  ;;  %v953_v14 = vld [vmem:[%s2320_s5 + $0x18] sm:$0xff] }
  0x5c   : > { %1431 = vmatpush1.bf16.msra.mxu1 %v1430_v18  ;;  %1369 = vmatprep.subr.bf16.mxu0 %v1368_v22  ;;  %v746_v18 = vld [vmem:[%s2318_s3 + $0x398] sm:$0xff]  ;;  %v747_v22 = vld [vmem:[%s2318_s3 + $0x3a0] sm:$0xff] }
  0x5d   : > { %1433 = vmatprep.subr.bf16.mxu1 %v1432_v26  ;;  %v1452_v23 = vpack.c.bf16 %v750_v20, %v746_v18  ;;  %v1390_v24 = vpack.c.bf16 %v747_v22, %v743_v21  ;;  %v749_v26 = vld [vmem:[%s2318_s3 + $0x3b0] sm:$0xff]  ;;  %v1467_v18 = vpack.c.bf16 %v955_v17, %v954_v16  ;;  %v957_v20 = vld [vmem:[%s2320_s5 + $0x38] sm:$0xff]  ;;  %v958_v22 = vld [vmem:[%s2320_s5 + $0x40] sm:$0xff] }
  0x5f   : > { %1371 = vmatpush1.bf16.msra.mxu0 %v1370_v27  ;;  %v1454_v27 = vpack.c.bf16 %v749_v26, %v745_v25  ;;  %v960_v25 = vld [vmem:[%s2320_s5 + $0x50] sm:$0xff]  ;;  %v961_v26 = vld [vmem:[%s2320_s5 + $0x58] sm:$0xff] }
  0x60   : > { %1435 = vmatpush1.bf16.msra.mxu1 %v1434_v30  ;;  %1373 = vmatprep.subr.bf16.mxu0 %v1372_v34  ;;  %v754_v30 = vld [vmem:[%s2318_s3 + $0x3d8] sm:$0xff]  ;;  %v755_v34 = vld [vmem:[%s2318_s3 + $0x3e0] sm:$0xff]  ;;  %v1476_v28 = vpack.c.bf16 %v961_v26, %v960_v25 }
  0x61   : > { %1437 = vmatprep.subr.bf16.mxu1 %v1436_v38  ;;  %v1456_v35 = vpack.c.bf16 %v758_v32, %v754_v30  ;;  %v1394_v36 = vpack.c.bf16 %v755_v34, %v751_v33  ;;  %v757_v38 = vld [vmem:[%s2318_s3 + $0x3f0] sm:$0xff]  ;;  %v965_v32 = vld [vmem:[%s2320_s5 + $0x78] sm:$0xff]  ;;  %v761_v34 = vlaneseq }
  0x63   : > { %1375 = vmatpush1.bf16.msra.mxu0 %v1374_v39  ;;  %v1458_v39 = vpack.c.bf16 %v757_v38, %v753_v37 }
  0x64   : > { %1439 = vmatpush1.bf16.msra.mxu1 %v1438_v42  ;;  %1377 = vmatprep.subr.bf16.mxu0 %v1376_v46  ;;  %v389_v42 = vld [vmem:[%s1650_s14 + $0x8] sm:$0xff] }
  0x65   : > { %1441 = vmatprep.subr.bf16.mxu1 %v1440_v50 }
  0x67   : > { %1379 = vmatpush1.bf16.msra.mxu0 %v1378_v51 }
  0x68   : > { %1443 = vmatpush1.bf16.msra.mxu1 %v1442_v54  ;;  %1381 = vmatprep.subr.bf16.mxu0 %v1380_v58 }
  0x69   : > { %1445 = vmatprep.subr.bf16.mxu1 %v1444_v62  ;;  %v621_v62 = vld [vmem:[#allocation3] sm:$0xff] }
  0x6b   : > { %1383 = vmatpush1.bf16.msra.mxu0 %v1382_v63 }
  0x6c   : > { %1447 = vmatpush1.bf16.msra.mxu1 %v1446_v2  ;;  %1385 = vmatprep.subr.bf16.mxu0 %v1384_v6 }
  0x6d   : > { %1449 = vmatprep.subr.bf16.mxu1 %v1448_v11  ;;  %v1461_v11 = vpack.c.bf16 %v951_v10, %v950_v8  ;;  %v1210_v10 = vld [vmem:[%s2321_s6] ss:$0 sm:$0xff] }
  0x6f   : > { %1387 = vmatpush1.bf16.msra.mxu0 %v1386_v12  ;;  %v1578_v12 = vmov 0.0|0.0  }
  0x70   : > { %1451 = vmatpush1.bf16.msra.mxu1 %v1450_v15  ;;  %1389 = vmatprep.subr.bf16.mxu0 %v1388_v19  ;;  %v1464_v15 = vpack.c.bf16 %v953_v14, %v952_v13  ;;  %v956_v19 = vld [vmem:[%s2320_s5 + $0x30] sm:$0xff]  ;;  %v1047_v13 = vld [vmem:[#allocation5] sm:$0xff] }
  0x71   : > { %1453 = vmatprep.subr.bf16.mxu1 %v1452_v23  ;;  %v1470_v21 = vpack.c.bf16 %v957_v20, %v956_v19  ;;  %v959_v23 = vld [vmem:[%s2320_s5 + $0x48] sm:$0xff] }
  0x72   : > { %v1049_v20 = vld [vmem:[#allocation6] sm:$0xff] }
  0x73   : > { %1391 = vmatpush1.bf16.msra.mxu0 %v1390_v24  ;;  %v1473_v24 = vpack.c.bf16 %v959_v23, %v958_v22 }
  0x74   : > { %1455 = vmatpush1.bf16.msra.mxu1 %v1454_v27  ;;  %1393 = vmatprep.subr.bf16.mxu0 %v1392_v31  ;;  %v962_v27 = vld [vmem:[%s2320_s5 + $0x60] sm:$0xff]  ;;  %v964_v31 = vld [vmem:[%s2320_s5 + $0x70] sm:$0xff] }
  0x75   : > { %1457 = vmatprep.subr.bf16.mxu1 %v1456_v35  ;;  %v1479_v30 = vpack.c.bf16 %v963_v29, %v962_v27  ;;  %v1482_v33 = vpack.c.bf16 %v965_v32, %v964_v31  ;;  %v762_v35 = vshrl.u32 %v761_v34, 7 }
  0x77   : > { %1395 = vmatpush1.bf16.msra.mxu0 %v1394_v36  ;;  %v763_v36 = vsub.s32 0, %v762_v35  ;;  %v767_v37 = vsub.s32 1, %v762_v35 }
  0x78   : > { %1459 = vmatpush1.bf16.msra.mxu1 %v1458_v39  ;;  %1460 = vmatprep.subr.bf16.mxu0 %v1578_v12 }
 0x10d   : > { %v522_v43 = vpop.f32.mrb[0].mxu0 }
 0x10e   : > { %v598_v44 = vadd.f32 %v522_v43, %v388_v41  ;;  %v524_v45 = vpop.f32.mrb[1].mxu0  ;;  %v593_v50 = vpop.f32.mrb[0].mxu1 }
 0x10f   : > { %v599_v46 = vadd.f32 %v524_v45, %v389_v42  ;;  %v595_v51 = vpop.f32.mrb[1].mxu1  ;;  %v600_v55 = vadd.f32 %v593_v50, %v390_v53  ;;  %v775_v42 = vsub.s32 3, %v762_v35  ;;  %v771_v50 = vsub.s32 2, %v762_v35 }
 0x110   : > { %v1204_v47 = vmul.f32 -1.442695, %v598_v44  ;;  %v601_v52 = vadd.f32 %v595_v51, %v391_v49 }
 0x111   : > { %v1205_v48 = vmul.f32 -1.442695, %v599_v46 }
 0x112   : > { %1513 = vpow2.f32 %v1204_v47  ;;  %v1206_v54 = vmul.f32 -1.442695, %v601_v52 }
 0x113   : > { %1515 = vpow2.f32 %v1205_v48 }
 0x114   : > { %1517 = vpow2.f32 %v1206_v54 }
 0x115   : > { %1519 = vtanh.f32 %v600_v55 }
 0x11c   : > { %v1514_v56 = vpop.eup %1513 }
 0x11d   : > { %v1516_v57 = vpop.eup %1515  ;;  %v605_v58 = vadd.f32 1.0, %v1514_v56 }
 0x11e   : > { %v611_v59 = vadd.f32 1.0, %v1516_v57  ;;  %v1518_v60 = vpop.eup %1517 }
 0x11f   : > { %1521 = vrcp.f32 %v605_v58  ;;  %v1520_v61 = vpop.eup %1519  ;;  %v618_v0 = vadd.f32 1.0, %v1518_v60 }
 0x120   : > { %1523 = vrcp.f32 %v611_v59 }
 0x121   : > { %1525 = vrcp.f32 %v618_v0 }
 0x129   : > { %v1522_v63 = vpop.eup %1521 }
 0x12a   : > { %v1524_v1 = vpop.eup %1523  ;;  %v623_v2 = vmul.f32 %v1522_v63, %v1520_v61  ;;  %v942_v61 = vld [vmem:[#allocation4] sm:$0xff] }
 0x12b   : > { %v622_v3 = vmul.f32 %v1524_v1, %v621_v62  ;;  %v1526_v5 = vpop.eup %1525 }
 0x12d   : > { %v624_v4 = vadd.f32 %v623_v2, %v622_v3 }
 0x12f   : > { %1527 = vtanh.f32 %v624_v4  ;;  %627 = vst [vmem:[#allocation3] sm:$0xff] %v624_v4 }
 0x139   : > { %v1528_v6 = vpop.eup %1527 }
 0x13a   : > { %v626_v7 = vmul.f32 %v1528_v6, %v1526_v5 }
 0x13c   : > { %628 = vst [vmem:[#allocation2] sm:$0xff] %v626_v7  ;;  %846 = vmatmul.mubr.f32.vlgmr.msra.gmra.mrb[2].mxu0 %v626_v7  ;;  %917 = vmatmul.mubr.f32.vlgmr.msra.gmra.mrb[2].mxu1 %v626_v7  ;;  %v1036_v7 = vld [vmem:[%s1655_s17] sm:$0xff] }
 0x13d   : > { %1462 = vmatpush3.bf16.msra.mxu0 %v1461_v11  ;;  %1265 = vmatprep.mubr.msk.f32.mxu0 %vm1579_vm0, %v1577_v9  ;;  %v759_v9 = vld [vmem:[%s2319_s4] sm:$0xf] }
 0x13e   : > { %1463 = vmatprep.subr.bf16.mxu0 %v1578_v12  ;;  %v764_v38 = vrot.slane %v759_v9, %v763_v36  ;;  %v768_v39 = vrot.slane %v759_v9, %v767_v37  ;;  %v776_v49 = vrot.slane %v759_v9, %v775_v42  ;;  %v772_v52 = vrot.slane %v759_v9, %v771_v50 }
 0x141   : > { %1465 = vmatpush3.bf16.msra.mxu0 %v1464_v15 }
 0x142   : > { %1466 = vmatprep.subr.bf16.mxu0 %v1578_v12 }
 0x145   : > { %1468 = vmatpush3.bf16.msra.mxu0 %v1467_v18 }
 0x146   : > { %1469 = vmatprep.subr.bf16.mxu0 %v1578_v12 }
 0x149   : > { %1471 = vmatpush3.bf16.msra.mxu0 %v1470_v21 }
 0x14a   : > { %1472 = vmatprep.subr.bf16.mxu0 %v1578_v12 }
 0x14d   : > { %1474 = vmatpush3.bf16.msra.mxu0 %v1473_v24 }
 0x14e   : > { %1475 = vmatprep.subr.bf16.mxu0 %v1578_v12 }
 0x151   : > { %1477 = vmatpush3.bf16.msra.mxu0 %v1476_v28 }
 0x152   : > { %1478 = vmatprep.subr.bf16.mxu0 %v1578_v12 }
 0x155   : > { %1480 = vmatpush3.bf16.msra.mxu0 %v1479_v30 }
 0x156   : > { %1481 = vmatprep.subr.bf16.mxu0 %v1578_v12 }
 0x159   : > { %1483 = vmatpush3.bf16.msra.mxu0 %v1482_v33 }
 0x20f   : > { %v847_v40 = vpop.f32.mrb[2].mxu0  ;;  %v918_v41 = vpop.f32.mrb[2].mxu1 }
 0x210   : > { %v848_v43 = vadd.f32 %v847_v40, %v764_v38  ;;  %v849_v44 = vpop.f32.mrb[3].mxu0  ;;  %v920_v45 = vpop.f32.mrb[3].mxu1  ;;  %v919_v54 = vadd.f32 %v918_v41, %v772_v52 }
 0x211   : > { %v850_v46 = vadd.f32 %v849_v44, %v768_v39  ;;  %v921_v51 = vadd.f32 %v920_v45, %v776_v49 }
 0x212   : > { %v1207_v47 = vmul.f32 -1.442695, %v848_v43 }
 0x213   : > { %v1208_v48 = vmul.f32 -1.442695, %v850_v46  ;;  %v1209_v53 = vmul.f32 -1.442695, %v921_v51 }
 0x214   : > { %1529 = vpow2.f32 %v1207_v47 }
 0x215   : > { %1531 = vpow2.f32 %v1208_v48 }
 0x216   : > { %1533 = vpow2.f32 %v1209_v53 }
 0x217   : > { %1535 = vtanh.f32 %v919_v54 }
 0x21e   : > { %v1530_v55 = vpop.eup %1529 }
 0x21f   : > { %v1532_v56 = vpop.eup %1531  ;;  %v926_v57 = vadd.f32 1.0, %v1530_v55 }
 0x220   : > { %v932_v58 = vadd.f32 1.0, %v1532_v56  ;;  %v1534_v59 = vpop.eup %1533 }
 0x221   : > { %1537 = vrcp.f32 %v926_v57  ;;  %v1536_v60 = vpop.eup %1535  ;;  %v939_v1 = vadd.f32 1.0, %v1534_v59 }
 0x222   : > { %1539 = vrcp.f32 %v932_v58 }
 0x223   : > { %1541 = vrcp.f32 %v939_v1 }
 0x22b   : > { %v1538_v62 = vpop.eup %1537 }
 0x22c   : > { %v1540_v63 = vpop.eup %1539  ;;  %v944_v0 = vmul.f32 %v1538_v62, %v1536_v60 }
 0x22d   : > { %v943_v2 = vmul.f32 %v1540_v63, %v942_v61  ;;  %v1542_v4 = vpop.eup %1541 }
 0x22f   : > { %v945_v3 = vadd.f32 %v944_v0, %v943_v2 }
 0x231   : > { %948 = vst [vmem:[#allocation4] sm:$0xff] %v945_v3  ;;  %1543 = vtanh.f32 %v945_v3 }
 0x23b   : > { %v1544_v5 = vpop.eup %1543 }
 0x23c   : > { %v947_v6 = vmul.f32 %v1544_v5, %v1542_v4 }
 0x23e   : > { %949 = vst [vmem:[#allocation2 + $0x8] sm:$0xff] %v947_v6  ;;  %1266 = vmatmul.mubr.f32.vlgmr.msra.gmra.mrb[4].mxu0 %v947_v6 }
 0x311   : > { %v1032_v8 = vpop.f32.mrb[4].mxu0 }
 0x312   : > { %v1037_v11 = vmul.f32 %v1036_v7, %v1032_v8  ;;  %v1267_v12 = vpop.f32.mrb[5].mxu0 }
 0x314   : > { %v1045_v14 = vadd.f32 %v1210_v10, %v1037_v11 }
 0x316   : > { %1046 = vst [vmem:[%s1660_s20] sm:$0xff] %v1045_v14  ;;  %v1048_v15 = vmax.f32 %v1047_v13, %v1045_v14 }
 0x318   : > { %v1050_v16 = vsub.f32 %v1047_v13, %v1048_v15  ;;  %v1054_v17 = vsub.f32 %v1045_v14, %v1048_v15  ;;  %1059 = vst [vmem:[#allocation5] sm:$0xff] %v1048_v15 }
 0x31a   : > { %v1051_v18 = vmul.f32 1.442695, %v1050_v16  ;;  %v1055_v19 = vmul.f32 1.442695, %v1054_v17 }
 0x31c   : > { %1545 = vpow2.f32 %v1051_v18 }
 0x31d   : > { %1547 = vpow2.f32 %v1055_v19 }
 0x31f   : > { %v1064_v27 = vld [vmem:[#allocation5] sm:$0xff] (!%p1211_p6) }
 0x325   : > { %1063 = sbr.rel (%p1211_p6) target bundleno = 835 (0x343), region = 56 }
 0x326   : > { %v1546_v21 = vpop.eup %1545 }
 0x327   : > { %v1053_v22 = vmul.f32 %v1546_v21, %v1049_v20  ;;  %v1548_v23 = vpop.eup %1547 }
 0x329   : > { %v1057_v24 = vadd.f32 %v1548_v23, %v1053_v22 }
 0x32b   : > { %1058 = vst [vmem:[#allocation6] sm:$0xff] %v1057_v24 }
 0x332   : > { %v1065_v25 = vld [vmem:[#allocation6] sm:$0xff] }
 0x333   : > { %1549 = vlog2.f32 %v1065_v25 }
 0x33d   : > { %v1550_v26 = vpop.eup %1549 }
 0x33e   : > { %v1067_v28 = vmul.f32 0.6931472, %v1550_v26 }
 0x340   : > { %v1068_v29 = vadd.f32 %v1067_v28, %v1064_v27 }
 0x342   : > { %1069 = vst [vmem:[%s2323_s8] sm:$0xff] %v1068_v29 }
 0x343 PF: > { %s19_s29 = sadd.s32 1, %s1573_s29   ;;  %s2324_s27 = smov %s1569_s28 }
 0x344   : > { %p16_p7 = scmp.ge.s32.totalorder %s19_s29, 10   ;;  %s2325_s28 = smov %s2327_s30 }
 0x346   :  { %18 = sbr.rel (!%p16_p7) target bundleno = 2 (0x2), region = 101 }

</bundles_post_ra>
